<compile_context>
chip_gen: v5e
topology: v5e:2x2
jax: 0.10.0
libtpu: 0.0.40
codegen_flags: <defaults>
</compile_context>

<pallas_src>
import functools

import jax
import jax.numpy as jnp
from jax.experimental import pallas as pl
from jax.experimental.pallas import tpu as pltpu

KL_LANES = 128  # lane-dense per-batch KL slab (column 0 read outside)


# --------------------------------------------------------------------------
# Fused Pallas kernel: prior+KL, p_projection, p_deterministic (2 conv blocks)
# --------------------------------------------------------------------------
def _fused_stage_kernel(d_ref, mu_q_ref, lv_q_ref, z_ref, aux0_ref, aux1_ref,
                        w_prior_ref, b_prior_ref, w_proj_ref, b_proj_ref,
                        w0_ref, b0_ref, w1_ref, b1_ref,
                        kl_ref, p_ref, h1_ref, h2_ref,
                        pad_ref, im_ref, *, H, W, C, Z):
    HW = H * W

    # ---- stochastic.generate(d): 1x1-conv prior p(z|d), mu|logvar fused ----
    d2 = d_ref[0].reshape(HW, C)
    prior = jnp.dot(d2, w_prior_ref[...],
                    preferred_element_type=jnp.float32) + b_prior_ref[...]
    mu_p = prior[:, :Z]
    lv_p = prior[:, Z:]

    # ---- stochastic.loss(posterior, p): analytic KL(q||p), summed ----
    mu_q = mu_q_ref[0].reshape(HW, Z)
    lv_q = lv_q_ref[0].reshape(HW, Z)
    kl_el = 0.5 * (lv_p - lv_q
                   + (jnp.exp(lv_q) + (mu_q - mu_p) ** 2) * jnp.exp(-lv_p)
                   - 1.0)
    kl_ref[...] = jnp.full((1, 1, KL_LANES), jnp.sum(kl_el), jnp.float32)
    p_ref[...] = prior.reshape(1, HW, 2 * Z)     # [mu_p | lv_p] combined slab

    # ---- p_projection(z): 1x1 conv Z -> C (stays in VMEM, fed to conv0) ----
    h0 = jnp.dot(z_ref[0].reshape(HW, Z), w_proj_ref[...],
                 preferred_element_type=jnp.float32) + b_proj_ref[...]

    # ---- p_deterministic: two 3x3 same-padding conv blocks ----
    # Shared zero-padded scratch, zeroed once per grid step (the interior is
    # fully overwritten by each conv; the border stays zero).  Safe under
    # "parallel" (megacore) semantics since nothing persists across steps.
    pad_ref[...] = jnp.zeros(pad_ref.shape, jnp.float32)

    def conv3x3(hin, w_ref, b_ref):
        # im2col slab (HW, 9C) built in VMEM, then ONE MXU matmul.
        pad_ref[1:H + 1, 1:W + 1, :] = hin.reshape(H, W, C)
        for k in range(9):
            dy, dx = divmod(k, 3)
            im_ref[:, k * C:(k + 1) * C] = (
                pad_ref[dy:dy + H, dx:dx + W, :].reshape(HW, C))
        return jnp.dot(im_ref[...], w_ref[...],
                       preferred_element_type=jnp.float32) + b_ref[...]

    aux0 = aux0_ref[0].reshape(HW, C)
    aux1 = aux1_ref[0].reshape(HW, C)
    h1 = jnp.maximum(conv3x3(h0 + aux0, w0_ref, b0_ref), 0.0)       # no residual
    h2 = jnp.maximum(conv3x3(h1 + aux1, w1_ref, b1_ref), 0.0) + h1  # residual

    h1_ref[...] = h1.reshape(1, HW, C)
    h2_ref[...] = h2.reshape(1, HW, C)


# --------------------------------------------------------------------------
# Wrapper: one pallas_call + output reshapes (no per-op transposes)
# --------------------------------------------------------------------------
def fuse_params(params):
    """Pack the per-module weights into the fused-kernel layout (done once)."""
    co0 = params["w_det0"].shape[-1]
    co1 = params["w_det1"].shape[-1]
    return {
        "w_prior": jnp.concatenate(
            [params["w_prior_mu"], params["w_prior_lv"]], axis=-1),  # (C, 2Z)
        "b_prior": jnp.concatenate(
            [params["b_prior_mu"], params["b_prior_lv"]], axis=-1),  # (1, 2Z)
        "w_proj": params["w_proj"],                                  # (Z, C)
        "b_proj": params["b_proj"],                                  # (1, C)
        "w_det0": params["w_det0"].reshape(-1, co0),                 # (9C, C)
        "b_det0": params["b_det0"],
        "w_det1": params["w_det1"].reshape(-1, co1),                 # (9C, C)
        "b_det1": params["b_det1"],
    }


def vae_stage_forward(fparams, d, aux, mu_q, lv_q, z):
    """VaeStage.forward(io, posterior, decode_from_p=False) training path.

    All tensors are channels-last: d/aux (B, H, W, C), posterior (B, H, W, Z).
    Returns (io_out, stage_data) mirroring the PyTorch module.
    """
    B, H, W, C = d.shape
    Z = z.shape[-1]
    HW = H * W
    kernel = functools.partial(_fused_stage_kernel, H=H, W=W, C=C, Z=Z)

    def img_spec():
        return pl.BlockSpec((1, H, W, C), lambda i: (i, 0, 0, 0))

    def lat_spec():
        return pl.BlockSpec((1, H, W, Z), lambda i: (i, 0, 0, 0))

    def full_spec(shape):
        return pl.BlockSpec(shape, lambda i: (0,) * len(shape))

    kl_slab, p_cat, h1_flat, h2_flat = pl.pallas_call(
        kernel,
        out_shape=(
            jax.ShapeDtypeStruct((B, 1, KL_LANES), jnp.float32),
            jax.ShapeDtypeStruct((B, HW, 2 * Z), jnp.float32),
            jax.ShapeDtypeStruct((B, HW, C), jnp.float32),
            jax.ShapeDtypeStruct((B, HW, C), jnp.float32),
        ),
        grid=(B,),
        in_specs=[
            img_spec(),                           # d
            lat_spec(),                           # posterior.mu
            lat_spec(),                           # posterior.logvar
            lat_spec(),                           # posterior.z
            img_spec(),                           # aux[0]
            img_spec(),                           # aux[1]
            full_spec(fparams["w_prior"].shape),
            full_spec(fparams["b_prior"].shape),
            full_spec(fparams["w_proj"].shape),
            full_spec(fparams["b_proj"].shape),
            full_spec(fparams["w_det0"].shape),
            full_spec(fparams["b_det0"].shape),
            full_spec(fparams["w_det1"].shape),
            full_spec(fparams["b_det1"].shape),
        ],
        out_specs=(
            pl.BlockSpec((1, 1, KL_LANES), lambda i: (i, 0, 0)),
            pl.BlockSpec((1, HW, 2 * Z), lambda i: (i, 0, 0)),
            pl.BlockSpec((1, HW, C), lambda i: (i, 0, 0)),
            pl.BlockSpec((1, HW, C), lambda i: (i, 0, 0)),
        ),
        scratch_shapes=[
            pltpu.VMEM((H + 2, W + 2, C), jnp.float32),   # zero-padded input
            pltpu.VMEM((HW, 9 * C), jnp.float32),         # im2col slab
        ],
        compiler_params=pltpu.CompilerParams(
            dimension_semantics=("parallel",)),
    )(d, mu_q, lv_q, z, aux[0], aux[1],
      fparams["w_prior"], fparams["b_prior"],
      fparams["w_proj"], fparams["b_proj"],
      fparams["w_det0"], fparams["b_det0"],
      fparams["w_det1"], fparams["b_det1"])

    kl = kl_slab[:, 0, 0]
    p_all = p_cat.reshape(B, H, W, 2 * Z)
    mu_p, lv_p = p_all[..., :Z], p_all[..., Z:]
    h1 = h1_flat.reshape(B, H, W, C)
    h2 = h2_flat.reshape(B, H, W, C)

    io_out = {"d": h2, "aux": [h1, h2]}
    stage_data = {
        "q": {"mu": mu_q, "logvar": lv_q, "z": z},
        "p": {"mu": mu_p, "logvar": lv_p},
        "loss": {"kl": kl},
    }
    # TODO(synk): prior-sampling path (posterior is None / decode_from_p=True)
    # is not implemented; this covers the training path z = posterior.z.
    return io_out, stage_data


# --------------------------------------------------------------------------
# Pure-JAX reference (same math, original un-fused params) for correctness
# --------------------------------------------------------------------------
def _conv3x3_ref(x, aux, w, b, residual):
    B, H, W, Cin = x.shape
    Cout = w.shape[-1]
    hp = jnp.pad(x + aux, ((0, 0), (1, 1), (1, 1), (0, 0)))
    acc = jnp.zeros((B, H, W, Cout), jnp.float32)
    for dy in range(3):
        for dx in range(3):
            acc = acc + jnp.einsum("bhwc,co->bhwo",
                                   hp[:, dy:dy + H, dx:dx + W, :], w[dy, dx])
    y = jnp.maximum(acc + b.reshape(1, 1, 1, Cout), 0.0)
    return y + x if residual else y


def reference_forward(params, d, aux, mu_q, lv_q, z):
    B, H, W, C = d.shape
    Z = z.shape[-1]

    mu_p = jnp.einsum("bhwc,cz->bhwz", d, params["w_prior_mu"]) \
        + params["b_prior_mu"].reshape(1, 1, 1, Z)
    lv_p = jnp.einsum("bhwc,cz->bhwz", d, params["w_prior_lv"]) \
        + params["b_prior_lv"].reshape(1, 1, 1, Z)
    var_q, var_p = jnp.exp(lv_q), jnp.exp(lv_p)
    kl_el = 0.5 * (lv_p - lv_q + (var_q + (mu_q - mu_p) ** 2) / var_p - 1.0)
    kl = jnp.sum(kl_el.reshape(B, -1), axis=-1)

    h = jnp.einsum("bhwz,zc->bhwc", z, params["w_proj"]) \
        + params["b_proj"].reshape(1, 1, 1, C)
    h1 = _conv3x3_ref(h, aux[0], params["w_det0"], params["b_det0"], False)
    h2 = _conv3x3_ref(h1, aux[1], params["w_det1"], params["b_det1"], True)

    io_out = {"d": h2, "aux": [h1, h2]}
    stage_data = {
        "q": {"mu": mu_q, "logvar": lv_q, "z": z},
        "p": {"mu": mu_p, "logvar": lv_p},
        "loss": {"kl": kl},
    }
    return io_out, stage_data


# --------------------------------------------------------------------------
if __name__ == "__main__":
    B, C, H, W, Z = 2, 8, 8, 8, 8  # small shapes consistent with the module

    key = jax.random.PRNGKey(0)
    ks = jax.random.split(key, 11)
    params = {
        # stochastic prior p(z|d): 1x1 conv C -> (mu, logvar)
        "w_prior_mu": 0.1 * jax.random.normal(ks[0], (C, Z), jnp.float32),
        "w_prior_lv": 0.1 * jax.random.normal(ks[1], (C, Z), jnp.float32),
        "b_prior_mu": 0.1 * jax.random.normal(ks[2], (1, Z), jnp.float32),
        "b_prior_lv": 0.1 * jax.random.normal(ks[3], (1, Z), jnp.float32),
        # p_projection (AsFeatureMap): 1x1 conv Z -> C
        "w_proj": 0.1 * jax.random.normal(ks[4], (Z, C), jnp.float32),
        "b_proj": 0.1 * jax.random.normal(ks[5], (1, C), jnp.float32),
        # p_deterministic: two 3x3 convs C -> C
        "w_det0": 0.1 * jax.random.normal(ks[6], (3, 3, C, C), jnp.float32),
        "b_det0": 0.1 * jax.random.normal(ks[7], (1, C), jnp.float32),
        "w_det1": 0.1 * jax.random.normal(ks[8], (3, 3, C, C), jnp.float32),
        "b_det1": 0.1 * jax.random.normal(ks[9], (1, C), jnp.float32),
    }
    fparams = fuse_params(params)   # one-time weight packing for the kernel

    ki = jax.random.split(ks[10], 6)
    d = jax.random.normal(ki[0], (B, H, W, C), jnp.float32)      # io.d
    aux0 = jax.random.normal(ki[1], (B, H, W, C), jnp.float32)   # io.aux[0]
    aux1 = jax.random.normal(ki[2], (B, H, W, C), jnp.float32)   # io.aux[1]
    mu_q = jax.random.normal(ki[3], (B, H, W, Z), jnp.float32)   # posterior.mu
    lv_q = 0.5 * jax.random.normal(ki[4], (B, H, W, Z), jnp.float32)
    z_q = mu_q + jnp.exp(0.5 * lv_q) * jax.random.normal(
        ki[5], (B, H, W, Z), jnp.float32)                        # posterior.z

    fwd = jax.jit(vae_stage_forward)
    out = fwd(fparams, d, (aux0, aux1), mu_q, lv_q, z_q)
    jax.block_until_ready(out)

    ref = reference_forward(params, d, (aux0, aux1), mu_q, lv_q, z_q)
    for got, want in zip(jax.tree_util.tree_leaves(out),
                         jax.tree_util.tree_leaves(ref)):
        assert got.shape == want.shape, (got.shape, want.shape)
        assert jnp.allclose(got, want, rtol=1e-2, atol=1e-2), (
            float(jnp.max(jnp.abs(got - want))))

    # StageData.metadata (plain python, no compute)
    stage_metadata = {"decode_from_p": False, "bu_inference": None}

    print("KERNEL_OK")
</pallas_src>

<mosaic_0001>
module attributes {stable_mosaic.version = 11 : i64} {
  func.func @_fused_stage_kernel(%arg0: i32, %arg1: memref<1x8x8x8xf32, #tpu.memory_space<vmem>>, %arg2: memref<1x8x8x8xf32, #tpu.memory_space<vmem>>, %arg3: memref<1x8x8x8xf32, #tpu.memory_space<vmem>>, %arg4: memref<1x8x8x8xf32, #tpu.memory_space<vmem>>, %arg5: memref<1x8x8x8xf32, #tpu.memory_space<vmem>>, %arg6: memref<1x8x8x8xf32, #tpu.memory_space<vmem>>, %arg7: memref<8x16xf32, #tpu.memory_space<vmem>>, %arg8: memref<1x16xf32, #tpu.memory_space<vmem>>, %arg9: memref<8x8xf32, #tpu.memory_space<vmem>>, %arg10: memref<1x8xf32, #tpu.memory_space<vmem>>, %arg11: memref<72x8xf32, #tpu.memory_space<vmem>>, %arg12: memref<1x8xf32, #tpu.memory_space<vmem>>, %arg13: memref<72x8xf32, #tpu.memory_space<vmem>>, %arg14: memref<1x8xf32, #tpu.memory_space<vmem>>, %arg15: memref<1x1x128xf32, #tpu.memory_space<vmem>>, %arg16: memref<1x64x16xf32, #tpu.memory_space<vmem>>, %arg17: memref<1x64x8xf32, #tpu.memory_space<vmem>>, %arg18: memref<1x64x8xf32, #tpu.memory_space<vmem>>, %arg19: memref<10x10x8xf32, #tpu.memory_space<vmem>>, %arg20: memref<64x72xf32, #tpu.memory_space<vmem>>) attributes {dimension_semantics = [#tpu.dimension_semantics<parallel>], iteration_bounds = array<i64: 2>, scalar_prefetch = 0 : i64, scratch_operands = 2 : i64, tpu.core_type = #tpu.core_type<tc>, window_params = [{transform_indices = @transform_0, window_bounds = array<i64: 1, 8, 8, 8>}, {transform_indices = @transform_1, window_bounds = array<i64: 1, 8, 8, 8>}, {transform_indices = @transform_2, window_bounds = array<i64: 1, 8, 8, 8>}, {transform_indices = @transform_3, window_bounds = array<i64: 1, 8, 8, 8>}, {transform_indices = @transform_4, window_bounds = array<i64: 1, 8, 8, 8>}, {transform_indices = @transform_5, window_bounds = array<i64: 1, 8, 8, 8>}, {pipeline_mode = #tpu.pipeline_mode<synchronous>, transform_indices = @transform_6, window_bounds = array<i64: 8, 16>}, {pipeline_mode = #tpu.pipeline_mode<synchronous>, transform_indices = @transform_7, window_bounds = array<i64: 1, 16>}, {pipeline_mode = #tpu.pipeline_mode<synchronous>, transform_indices = @transform_8, window_bounds = array<i64: 8, 8>}, {pipeline_mode = #tpu.pipeline_mode<synchronous>, transform_indices = @transform_9, window_bounds = array<i64: 1, 8>}, {pipeline_mode = #tpu.pipeline_mode<synchronous>, transform_indices = @transform_10, window_bounds = array<i64: 72, 8>}, {pipeline_mode = #tpu.pipeline_mode<synchronous>, transform_indices = @transform_11, window_bounds = array<i64: 1, 8>}, {pipeline_mode = #tpu.pipeline_mode<synchronous>, transform_indices = @transform_12, window_bounds = array<i64: 72, 8>}, {pipeline_mode = #tpu.pipeline_mode<synchronous>, transform_indices = @transform_13, window_bounds = array<i64: 1, 8>}, {transform_indices = @transform_14, window_bounds = array<i64: 1, 1, 128>}, {transform_indices = @transform_15, window_bounds = array<i64: 1, 64, 16>}, {transform_indices = @transform_16, window_bounds = array<i64: 1, 64, 8>}, {transform_indices = @transform_17, window_bounds = array<i64: 1, 64, 8>}]} {
    %c0 = arith.constant 0 : index
    %c0_0 = arith.constant 0 : index
    %c0_1 = arith.constant 0 : index
    %c0_2 = arith.constant 0 : index
    %0 = vector.load %arg1[%c0, %c0_0, %c0_1, %c0_2] : memref<1x8x8x8xf32, #tpu.memory_space<vmem>>, vector<1x8x8x8xf32>
    %1 = vector.shape_cast %0 : vector<1x8x8x8xf32> to vector<8x8x8xf32>
    %2 = vector.shape_cast %1 : vector<8x8x8xf32> to vector<64x8xf32>
    %c0_3 = arith.constant 0 : index
    %c0_4 = arith.constant 0 : index
    %3 = vector.load %arg7[%c0_3, %c0_4] : memref<8x16xf32, #tpu.memory_space<vmem>>, vector<8x16xf32>
    %cst = arith.constant dense<0.000000e+00> : vector<64x16xf32>
    %4 = tpu.matmul %2, %3, %cst {dimension_numbers = #tpu.dot_dimension_numbers<[1], [0], [0], [1], [0, 0, 1, 1], [], []>} : vector<64x8xf32>, vector<8x16xf32>, vector<64x16xf32> -> vector<64x16xf32>
    %c0_5 = arith.constant 0 : index
    %c0_6 = arith.constant 0 : index
    %5 = vector.load %arg8[%c0_5, %c0_6] : memref<1x16xf32, #tpu.memory_space<vmem>>, vector<1x16xf32>
    %6 = vector.broadcast %5 : vector<1x16xf32> to vector<64x16xf32>
    %7 = arith.addf %4, %6 : vector<64x16xf32>
    %8 = vector.extract_strided_slice %7 {offsets = [0, 0], sizes = [64, 8], strides = [1, 1]} : vector<64x16xf32> to vector<64x8xf32>
    %9 = vector.extract_strided_slice %7 {offsets = [0, 8], sizes = [64, 8], strides = [1, 1]} : vector<64x16xf32> to vector<64x8xf32>
    %c0_7 = arith.constant 0 : index
    %c0_8 = arith.constant 0 : index
    %c0_9 = arith.constant 0 : index
    %c0_10 = arith.constant 0 : index
    %10 = vector.load %arg2[%c0_7, %c0_8, %c0_9, %c0_10] : memref<1x8x8x8xf32, #tpu.memory_space<vmem>>, vector<1x8x8x8xf32>
    %11 = vector.shape_cast %10 : vector<1x8x8x8xf32> to vector<8x8x8xf32>
    %12 = vector.shape_cast %11 : vector<8x8x8xf32> to vector<64x8xf32>
    %c0_11 = arith.constant 0 : index
    %c0_12 = arith.constant 0 : index
    %c0_13 = arith.constant 0 : index
    %c0_14 = arith.constant 0 : index
    %13 = vector.load %arg3[%c0_11, %c0_12, %c0_13, %c0_14] : memref<1x8x8x8xf32, #tpu.memory_space<vmem>>, vector<1x8x8x8xf32>
    %14 = vector.shape_cast %13 : vector<1x8x8x8xf32> to vector<8x8x8xf32>
    %15 = vector.shape_cast %14 : vector<8x8x8xf32> to vector<64x8xf32>
    %16 = arith.subf %9, %15 : vector<64x8xf32>
    %17 = math.exp %15 : vector<64x8xf32>
    %18 = arith.subf %12, %8 : vector<64x8xf32>
    %19 = arith.mulf %18, %18 : vector<64x8xf32>
    %20 = arith.addf %17, %19 : vector<64x8xf32>
    %cst_15 = arith.constant 0.000000e+00 : f32
    %21 = vector.broadcast %cst_15 : f32 to vector<64x8xf32>
    %22 = arith.subf %21, %9 : vector<64x8xf32>
    %23 = math.exp %22 : vector<64x8xf32>
    %24 = arith.mulf %20, %23 : vector<64x8xf32>
    %25 = arith.addf %16, %24 : vector<64x8xf32>
    %cst_16 = arith.constant 1.000000e+00 : f32
    %26 = vector.broadcast %cst_16 : f32 to vector<64x8xf32>
    %27 = arith.subf %25, %26 : vector<64x8xf32>
    %cst_17 = arith.constant 5.000000e-01 : f32
    %28 = vector.broadcast %cst_17 : f32 to vector<64x8xf32>
    %29 = arith.mulf %28, %27 : vector<64x8xf32>
    %30 = vector.shape_cast %29 : vector<64x8xf32> to vector<1x64x8xf32>
    %cst_18 = arith.constant dense<0.000000e+00> : vector<1xf32>
    %31 = vector.multi_reduction <add>, %30, %cst_18 [1, 2] : vector<1x64x8xf32> to vector<1xf32>
    %32 = vector.shape_cast %31 : vector<1xf32> to vector<1x1x1xf32>
    %33 = vector.extract %32[0, 0, 0] : f32 from vector<1x1x1xf32>
    %34 = vector.broadcast %33 : f32 to vector<1x1x128xf32>
    %c0_19 = arith.constant 0 : index
    %c0_20 = arith.constant 0 : index
    %c0_21 = arith.constant 0 : index
    %35 = vector.load %arg15[%c0_19, %c0_20, %c0_21] : memref<1x1x128xf32, #tpu.memory_space<vmem>>, vector<1x1x128xf32>
    tpu.vector_store %arg15[%c0_19, %c0_20, %c0_21], %34 {strides = array<i32>} : memref<1x1x128xf32, #tpu.memory_space<vmem>>, vector<1x1x128xf32>,
    %36 = vector.shape_cast %7 : vector<64x16xf32> to vector<1x64x16xf32>
    %c0_22 = arith.constant 0 : index
    %c0_23 = arith.constant 0 : index
    %c0_24 = arith.constant 0 : index
    %37 = vector.load %arg16[%c0_22, %c0_23, %c0_24] : memref<1x64x16xf32, #tpu.memory_space<vmem>>, vector<1x64x16xf32>
    tpu.vector_store %arg16[%c0_22, %c0_23, %c0_24], %36 {strides = array<i32>} : memref<1x64x16xf32, #tpu.memory_space<vmem>>, vector<1x64x16xf32>,
    %c0_25 = arith.constant 0 : index
    %c0_26 = arith.constant 0 : index
    %c0_27 = arith.constant 0 : index
    %c0_28 = arith.constant 0 : index
    %38 = vector.load %arg4[%c0_25, %c0_26, %c0_27, %c0_28] : memref<1x8x8x8xf32, #tpu.memory_space<vmem>>, vector<1x8x8x8xf32>
    %39 = vector.shape_cast %38 : vector<1x8x8x8xf32> to vector<8x8x8xf32>
    %40 = vector.shape_cast %39 : vector<8x8x8xf32> to vector<64x8xf32>
    %c0_29 = arith.constant 0 : index
    %c0_30 = arith.constant 0 : index
    %41 = vector.load %arg9[%c0_29, %c0_30] : memref<8x8xf32, #tpu.memory_space<vmem>>, vector<8x8xf32>
    %cst_31 = arith.constant dense<0.000000e+00> : vector<64x8xf32>
    %42 = tpu.matmul %40, %41, %cst_31 {dimension_numbers = #tpu.dot_dimension_numbers<[1], [0], [0], [1], [0, 0, 1, 1], [], []>} : vector<64x8xf32>, vector<8x8xf32>, vector<64x8xf32> -> vector<64x8xf32>
    %c0_32 = arith.constant 0 : index
    %c0_33 = arith.constant 0 : index
    %43 = vector.load %arg10[%c0_32, %c0_33] : memref<1x8xf32, #tpu.memory_space<vmem>>, vector<1x8xf32>
    %44 = vector.broadcast %43 : vector<1x8xf32> to vector<64x8xf32>
    %45 = arith.addf %42, %44 : vector<64x8xf32>
    %cst_34 = arith.constant 0.000000e+00 : f32
    %46 = vector.broadcast %cst_34 : f32 to vector<10x10x8xf32>
    %c0_35 = arith.constant 0 : index
    %c0_36 = arith.constant 0 : index
    %c0_37 = arith.constant 0 : index
    %47 = vector.load %arg19[%c0_35, %c0_36, %c0_37] : memref<10x10x8xf32, #tpu.memory_space<vmem>>, vector<10x10x8xf32>
    tpu.vector_store %arg19[%c0_35, %c0_36, %c0_37], %46 {strides = array<i32>} : memref<10x10x8xf32, #tpu.memory_space<vmem>>, vector<10x10x8xf32>,
    %c0_38 = arith.constant 0 : index
    %c0_39 = arith.constant 0 : index
    %c0_40 = arith.constant 0 : index
    %c0_41 = arith.constant 0 : index
    %48 = vector.load %arg5[%c0_38, %c0_39, %c0_40, %c0_41] : memref<1x8x8x8xf32, #tpu.memory_space<vmem>>, vector<1x8x8x8xf32>
    %49 = vector.shape_cast %48 : vector<1x8x8x8xf32> to vector<8x8x8xf32>
    %50 = vector.shape_cast %49 : vector<8x8x8xf32> to vector<64x8xf32>
    %c0_42 = arith.constant 0 : index
    %c0_43 = arith.constant 0 : index
    %c0_44 = arith.constant 0 : index
    %c0_45 = arith.constant 0 : index
    %51 = vector.load %arg6[%c0_42, %c0_43, %c0_44, %c0_45] : memref<1x8x8x8xf32, #tpu.memory_space<vmem>>, vector<1x8x8x8xf32>
    %52 = vector.shape_cast %51 : vector<1x8x8x8xf32> to vector<8x8x8xf32>
    %53 = vector.shape_cast %52 : vector<8x8x8xf32> to vector<64x8xf32>
    %54 = arith.addf %45, %50 : vector<64x8xf32>
    %55 = vector.shape_cast %54 : vector<64x8xf32> to vector<8x8x8xf32>
    %c1 = arith.constant 1 : index
    %c1_46 = arith.constant 1 : index
    %c0_47 = arith.constant 0 : index
    %56 = vector.load %arg19[%c1, %c1_46, %c0_47] : memref<10x10x8xf32, #tpu.memory_space<vmem>>, vector<8x8x8xf32>
    tpu.vector_store %arg19[%c1, %c1_46, %c0_47], %55 {strides = array<i32>} : memref<10x10x8xf32, #tpu.memory_space<vmem>>, vector<8x8x8xf32>,
    %c0_48 = arith.constant 0 : index
    %c0_49 = arith.constant 0 : index
    %c0_50 = arith.constant 0 : index
    %57 = vector.load %arg19[%c0_48, %c0_49, %c0_50] : memref<10x10x8xf32, #tpu.memory_space<vmem>>, vector<8x8x8xf32>
    %58 = vector.shape_cast %57 : vector<8x8x8xf32> to vector<64x8xf32>
    %c0_51 = arith.constant 0 : index
    %c0_52 = arith.constant 0 : index
    %59 = vector.load %arg20[%c0_51, %c0_52] : memref<64x72xf32, #tpu.memory_space<vmem>>, vector<64x8xf32>
    tpu.vector_store %arg20[%c0_51, %c0_52], %58 {strides = array<i32>} : memref<64x72xf32, #tpu.memory_space<vmem>>, vector<64x8xf32>,
    %c0_53 = arith.constant 0 : index
    %c1_54 = arith.constant 1 : index
    %c0_55 = arith.constant 0 : index
    %60 = vector.load %arg19[%c0_53, %c1_54, %c0_55] : memref<10x10x8xf32, #tpu.memory_space<vmem>>, vector<8x8x8xf32>
    %61 = vector.shape_cast %60 : vector<8x8x8xf32> to vector<64x8xf32>
    %c0_56 = arith.constant 0 : index
    %c8 = arith.constant 8 : index
    %62 = vector.load %arg20[%c0_56, %c8] : memref<64x72xf32, #tpu.memory_space<vmem>>, vector<64x8xf32>
    tpu.vector_store %arg20[%c0_56, %c8], %61 {strides = array<i32>} : memref<64x72xf32, #tpu.memory_space<vmem>>, vector<64x8xf32>,
    %c0_57 = arith.constant 0 : index
    %c2 = arith.constant 2 : index
    %c0_58 = arith.constant 0 : index
    %63 = vector.load %arg19[%c0_57, %c2, %c0_58] : memref<10x10x8xf32, #tpu.memory_space<vmem>>, vector<8x8x8xf32>
    %64 = vector.shape_cast %63 : vector<8x8x8xf32> to vector<64x8xf32>
    %c0_59 = arith.constant 0 : index
    %c16 = arith.constant 16 : index
    %65 = vector.load %arg20[%c0_59, %c16] : memref<64x72xf32, #tpu.memory_space<vmem>>, vector<64x8xf32>
    tpu.vector_store %arg20[%c0_59, %c16], %64 {strides = array<i32>} : memref<64x72xf32, #tpu.memory_space<vmem>>, vector<64x8xf32>,
    %c1_60 = arith.constant 1 : index
    %c0_61 = arith.constant 0 : index
    %c0_62 = arith.constant 0 : index
    %66 = vector.load %arg19[%c1_60, %c0_61, %c0_62] : memref<10x10x8xf32, #tpu.memory_space<vmem>>, vector<8x8x8xf32>
    %67 = vector.shape_cast %66 : vector<8x8x8xf32> to vector<64x8xf32>
    %c0_63 = arith.constant 0 : index
    %c24 = arith.constant 24 : index
    %68 = vector.load %arg20[%c0_63, %c24] : memref<64x72xf32, #tpu.memory_space<vmem>>, vector<64x8xf32>
    tpu.vector_store %arg20[%c0_63, %c24], %67 {strides = array<i32>} : memref<64x72xf32, #tpu.memory_space<vmem>>, vector<64x8xf32>,
    %c1_64 = arith.constant 1 : index
    %c1_65 = arith.constant 1 : index
    %c0_66 = arith.constant 0 : index
    %69 = vector.load %arg19[%c1_64, %c1_65, %c0_66] : memref<10x10x8xf32, #tpu.memory_space<vmem>>, vector<8x8x8xf32>
    %70 = vector.shape_cast %69 : vector<8x8x8xf32> to vector<64x8xf32>
    %c0_67 = arith.constant 0 : index
    %c32 = arith.constant 32 : index
    %71 = vector.load %arg20[%c0_67, %c32] : memref<64x72xf32, #tpu.memory_space<vmem>>, vector<64x8xf32>
    tpu.vector_store %arg20[%c0_67, %c32], %70 {strides = array<i32>} : memref<64x72xf32, #tpu.memory_space<vmem>>, vector<64x8xf32>,
    %c1_68 = arith.constant 1 : index
    %c2_69 = arith.constant 2 : index
    %c0_70 = arith.constant 0 : index
    %72 = vector.load %arg19[%c1_68, %c2_69, %c0_70] : memref<10x10x8xf32, #tpu.memory_space<vmem>>, vector<8x8x8xf32>
    %73 = vector.shape_cast %72 : vector<8x8x8xf32> to vector<64x8xf32>
    %c0_71 = arith.constant 0 : index
    %c40 = arith.constant 40 : index
    %74 = vector.load %arg20[%c0_71, %c40] : memref<64x72xf32, #tpu.memory_space<vmem>>, vector<64x8xf32>
    tpu.vector_store %arg20[%c0_71, %c40], %73 {strides = array<i32>} : memref<64x72xf32, #tpu.memory_space<vmem>>, vector<64x8xf32>,
    %c2_72 = arith.constant 2 : index
    %c0_73 = arith.constant 0 : index
    %c0_74 = arith.constant 0 : index
    %75 = vector.load %arg19[%c2_72, %c0_73, %c0_74] : memref<10x10x8xf32, #tpu.memory_space<vmem>>, vector<8x8x8xf32>
    %76 = vector.shape_cast %75 : vector<8x8x8xf32> to vector<64x8xf32>
    %c0_75 = arith.constant 0 : index
    %c48 = arith.constant 48 : index
    %77 = vector.load %arg20[%c0_75, %c48] : memref<64x72xf32, #tpu.memory_space<vmem>>, vector<64x8xf32>
    tpu.vector_store %arg20[%c0_75, %c48], %76 {strides = array<i32>} : memref<64x72xf32, #tpu.memory_space<vmem>>, vector<64x8xf32>,
    %c2_76 = arith.constant 2 : index
    %c1_77 = arith.constant 1 : index
    %c0_78 = arith.constant 0 : index
    %78 = vector.load %arg19[%c2_76, %c1_77, %c0_78] : memref<10x10x8xf32, #tpu.memory_space<vmem>>, vector<8x8x8xf32>
    %79 = vector.shape_cast %78 : vector<8x8x8xf32> to vector<64x8xf32>
    %c0_79 = arith.constant 0 : index
    %c56 = arith.constant 56 : index
    %80 = vector.load %arg20[%c0_79, %c56] : memref<64x72xf32, #tpu.memory_space<vmem>>, vector<64x8xf32>
    tpu.vector_store %arg20[%c0_79, %c56], %79 {strides = array<i32>} : memref<64x72xf32, #tpu.memory_space<vmem>>, vector<64x8xf32>,
    %c2_80 = arith.constant 2 : index
    %c2_81 = arith.constant 2 : index
    %c0_82 = arith.constant 0 : index
    %81 = vector.load %arg19[%c2_80, %c2_81, %c0_82] : memref<10x10x8xf32, #tpu.memory_space<vmem>>, vector<8x8x8xf32>
    %82 = vector.shape_cast %81 : vector<8x8x8xf32> to vector<64x8xf32>
    %c0_83 = arith.constant 0 : index
    %c64 = arith.constant 64 : index
    %83 = vector.load %arg20[%c0_83, %c64] : memref<64x72xf32, #tpu.memory_space<vmem>>, vector<64x8xf32>
    tpu.vector_store %arg20[%c0_83, %c64], %82 {strides = array<i32>} : memref<64x72xf32, #tpu.memory_space<vmem>>, vector<64x8xf32>,
    %c0_84 = arith.constant 0 : index
    %c0_85 = arith.constant 0 : index
    %84 = vector.load %arg20[%c0_84, %c0_85] : memref<64x72xf32, #tpu.memory_space<vmem>>, vector<64x72xf32>
    %c0_86 = arith.constant 0 : index
    %c0_87 = arith.constant 0 : index
    %85 = vector.load %arg11[%c0_86, %c0_87] : memref<72x8xf32, #tpu.memory_space<vmem>>, vector<72x8xf32>
    %cst_88 = arith.constant dense<0.000000e+00> : vector<64x8xf32>
    %86 = tpu.matmul %84, %85, %cst_88 {dimension_numbers = #tpu.dot_dimension_numbers<[1], [0], [0], [1], [0, 0, 1, 1], [], []>} : vector<64x72xf32>, vector<72x8xf32>, vector<64x8xf32> -> vector<64x8xf32>
    %c0_89 = arith.constant 0 : index
    %c0_90 = arith.constant 0 : index
    %87 = vector.load %arg12[%c0_89, %c0_90] : memref<1x8xf32, #tpu.memory_space<vmem>>, vector<1x8xf32>
    %88 = vector.broadcast %87 : vector<1x8xf32> to vector<64x8xf32>
    %89 = arith.addf %86, %88 : vector<64x8xf32>
    %cst_91 = arith.constant 0.000000e+00 : f32
    %90 = vector.broadcast %cst_91 : f32 to vector<64x8xf32>
    %91 = arith.maximumf %89, %90 : vector<64x8xf32>
    %92 = arith.addf %91, %53 : vector<64x8xf32>
    %93 = vector.shape_cast %92 : vector<64x8xf32> to vector<8x8x8xf32>
    %c1_92 = arith.constant 1 : index
    %c1_93 = arith.constant 1 : index
    %c0_94 = arith.constant 0 : index
    %94 = vector.load %arg19[%c1_92, %c1_93, %c0_94] : memref<10x10x8xf32, #tpu.memory_space<vmem>>, vector<8x8x8xf32>
    tpu.vector_store %arg19[%c1_92, %c1_93, %c0_94], %93 {strides = array<i32>} : memref<10x10x8xf32, #tpu.memory_space<vmem>>, vector<8x8x8xf32>,
    %c0_95 = arith.constant 0 : index
    %c0_96 = arith.constant 0 : index
    %c0_97 = arith.constant 0 : index
    %95 = vector.load %arg19[%c0_95, %c0_96, %c0_97] : memref<10x10x8xf32, #tpu.memory_space<vmem>>, vector<8x8x8xf32>
    %96 = vector.shape_cast %95 : vector<8x8x8xf32> to vector<64x8xf32>
    %c0_98 = arith.constant 0 : index
    %c0_99 = arith.constant 0 : index
    %97 = vector.load %arg20[%c0_98, %c0_99] : memref<64x72xf32, #tpu.memory_space<vmem>>, vector<64x8xf32>
    tpu.vector_store %arg20[%c0_98, %c0_99], %96 {strides = array<i32>} : memref<64x72xf32, #tpu.memory_space<vmem>>, vector<64x8xf32>,
    %c0_100 = arith.constant 0 : index
    %c1_101 = arith.constant 1 : index
    %c0_102 = arith.constant 0 : index
    %98 = vector.load %arg19[%c0_100, %c1_101, %c0_102] : memref<10x10x8xf32, #tpu.memory_space<vmem>>, vector<8x8x8xf32>
    %99 = vector.shape_cast %98 : vector<8x8x8xf32> to vector<64x8xf32>
    %c0_103 = arith.constant 0 : index
    %c8_104 = arith.constant 8 : index
    %100 = vector.load %arg20[%c0_103, %c8_104] : memref<64x72xf32, #tpu.memory_space<vmem>>, vector<64x8xf32>
    tpu.vector_store %arg20[%c0_103, %c8_104], %99 {strides = array<i32>} : memref<64x72xf32, #tpu.memory_space<vmem>>, vector<64x8xf32>,
    %c0_105 = arith.constant 0 : index
    %c2_106 = arith.constant 2 : index
    %c0_107 = arith.constant 0 : index
    %101 = vector.load %arg19[%c0_105, %c2_106, %c0_107] : memref<10x10x8xf32, #tpu.memory_space<vmem>>, vector<8x8x8xf32>
    %102 = vector.shape_cast %101 : vector<8x8x8xf32> to vector<64x8xf32>
    %c0_108 = arith.constant 0 : index
    %c16_109 = arith.constant 16 : index
    %103 = vector.load %arg20[%c0_108, %c16_109] : memref<64x72xf32, #tpu.memory_space<vmem>>, vector<64x8xf32>
    tpu.vector_store %arg20[%c0_108, %c16_109], %102 {strides = array<i32>} : memref<64x72xf32, #tpu.memory_space<vmem>>, vector<64x8xf32>,
    %c1_110 = arith.constant 1 : index
    %c0_111 = arith.constant 0 : index
    %c0_112 = arith.constant 0 : index
    %104 = vector.load %arg19[%c1_110, %c0_111, %c0_112] : memref<10x10x8xf32, #tpu.memory_space<vmem>>, vector<8x8x8xf32>
    %105 = vector.shape_cast %104 : vector<8x8x8xf32> to vector<64x8xf32>
    %c0_113 = arith.constant 0 : index
    %c24_114 = arith.constant 24 : index
    %106 = vector.load %arg20[%c0_113, %c24_114] : memref<64x72xf32, #tpu.memory_space<vmem>>, vector<64x8xf32>
    tpu.vector_store %arg20[%c0_113, %c24_114], %105 {strides = array<i32>} : memref<64x72xf32, #tpu.memory_space<vmem>>, vector<64x8xf32>,
    %c1_115 = arith.constant 1 : index
    %c1_116 = arith.constant 1 : index
    %c0_117 = arith.constant 0 : index
    %107 = vector.load %arg19[%c1_115, %c1_116, %c0_117] : memref<10x10x8xf32, #tpu.memory_space<vmem>>, vector<8x8x8xf32>
    %108 = vector.shape_cast %107 : vector<8x8x8xf32> to vector<64x8xf32>
    %c0_118 = arith.constant 0 : index
    %c32_119 = arith.constant 32 : index
    %109 = vector.load %arg20[%c0_118, %c32_119] : memref<64x72xf32, #tpu.memory_space<vmem>>, vector<64x8xf32>
    tpu.vector_store %arg20[%c0_118, %c32_119], %108 {strides = array<i32>} : memref<64x72xf32, #tpu.memory_space<vmem>>, vector<64x8xf32>,
    %c1_120 = arith.constant 1 : index
    %c2_121 = arith.constant 2 : index
    %c0_122 = arith.constant 0 : index
    %110 = vector.load %arg19[%c1_120, %c2_121, %c0_122] : memref<10x10x8xf32, #tpu.memory_space<vmem>>, vector<8x8x8xf32>
    %111 = vector.shape_cast %110 : vector<8x8x8xf32> to vector<64x8xf32>
    %c0_123 = arith.constant 0 : index
    %c40_124 = arith.constant 40 : index
    %112 = vector.load %arg20[%c0_123, %c40_124] : memref<64x72xf32, #tpu.memory_space<vmem>>, vector<64x8xf32>
    tpu.vector_store %arg20[%c0_123, %c40_124], %111 {strides = array<i32>} : memref<64x72xf32, #tpu.memory_space<vmem>>, vector<64x8xf32>,
    %c2_125 = arith.constant 2 : index
    %c0_126 = arith.constant 0 : index
    %c0_127 = arith.constant 0 : index
    %113 = vector.load %arg19[%c2_125, %c0_126, %c0_127] : memref<10x10x8xf32, #tpu.memory_space<vmem>>, vector<8x8x8xf32>
    %114 = vector.shape_cast %113 : vector<8x8x8xf32> to vector<64x8xf32>
    %c0_128 = arith.constant 0 : index
    %c48_129 = arith.constant 48 : index
    %115 = vector.load %arg20[%c0_128, %c48_129] : memref<64x72xf32, #tpu.memory_space<vmem>>, vector<64x8xf32>
    tpu.vector_store %arg20[%c0_128, %c48_129], %114 {strides = array<i32>} : memref<64x72xf32, #tpu.memory_space<vmem>>, vector<64x8xf32>,
    %c2_130 = arith.constant 2 : index
    %c1_131 = arith.constant 1 : index
    %c0_132 = arith.constant 0 : index
    %116 = vector.load %arg19[%c2_130, %c1_131, %c0_132] : memref<10x10x8xf32, #tpu.memory_space<vmem>>, vector<8x8x8xf32>
    %117 = vector.shape_cast %116 : vector<8x8x8xf32> to vector<64x8xf32>
    %c0_133 = arith.constant 0 : index
    %c56_134 = arith.constant 56 : index
    %118 = vector.load %arg20[%c0_133, %c56_134] : memref<64x72xf32, #tpu.memory_space<vmem>>, vector<64x8xf32>
    tpu.vector_store %arg20[%c0_133, %c56_134], %117 {strides = array<i32>} : memref<64x72xf32, #tpu.memory_space<vmem>>, vector<64x8xf32>,
    %c2_135 = arith.constant 2 : index
    %c2_136 = arith.constant 2 : index
    %c0_137 = arith.constant 0 : index
    %119 = vector.load %arg19[%c2_135, %c2_136, %c0_137] : memref<10x10x8xf32, #tpu.memory_space<vmem>>, vector<8x8x8xf32>
    %120 = vector.shape_cast %119 : vector<8x8x8xf32> to vector<64x8xf32>
    %c0_138 = arith.constant 0 : index
    %c64_139 = arith.constant 64 : index
    %121 = vector.load %arg20[%c0_138, %c64_139] : memref<64x72xf32, #tpu.memory_space<vmem>>, vector<64x8xf32>
    tpu.vector_store %arg20[%c0_138, %c64_139], %120 {strides = array<i32>} : memref<64x72xf32, #tpu.memory_space<vmem>>, vector<64x8xf32>,
    %c0_140 = arith.constant 0 : index
    %c0_141 = arith.constant 0 : index
    %122 = vector.load %arg20[%c0_140, %c0_141] : memref<64x72xf32, #tpu.memory_space<vmem>>, vector<64x72xf32>
    %c0_142 = arith.constant 0 : index
    %c0_143 = arith.constant 0 : index
    %123 = vector.load %arg13[%c0_142, %c0_143] : memref<72x8xf32, #tpu.memory_space<vmem>>, vector<72x8xf32>
    %cst_144 = arith.constant dense<0.000000e+00> : vector<64x8xf32>
    %124 = tpu.matmul %122, %123, %cst_144 {dimension_numbers = #tpu.dot_dimension_numbers<[1], [0], [0], [1], [0, 0, 1, 1], [], []>} : vector<64x72xf32>, vector<72x8xf32>, vector<64x8xf32> -> vector<64x8xf32>
    %c0_145 = arith.constant 0 : index
    %c0_146 = arith.constant 0 : index
    %125 = vector.load %arg14[%c0_145, %c0_146] : memref<1x8xf32, #tpu.memory_space<vmem>>, vector<1x8xf32>
    %126 = vector.broadcast %125 : vector<1x8xf32> to vector<64x8xf32>
    %127 = arith.addf %124, %126 : vector<64x8xf32>
    %cst_147 = arith.constant 0.000000e+00 : f32
    %128 = vector.broadcast %cst_147 : f32 to vector<64x8xf32>
    %129 = arith.maximumf %127, %128 : vector<64x8xf32>
    %130 = arith.addf %129, %91 : vector<64x8xf32>
    %131 = vector.shape_cast %91 : vector<64x8xf32> to vector<1x64x8xf32>
    %c0_148 = arith.constant 0 : index
    %c0_149 = arith.constant 0 : index
    %c0_150 = arith.constant 0 : index
    %132 = vector.load %arg17[%c0_148, %c0_149, %c0_150] : memref<1x64x8xf32, #tpu.memory_space<vmem>>, vector<1x64x8xf32>
    tpu.vector_store %arg17[%c0_148, %c0_149, %c0_150], %131 {strides = array<i32>} : memref<1x64x8xf32, #tpu.memory_space<vmem>>, vector<1x64x8xf32>,
    %133 = vector.shape_cast %130 : vector<64x8xf32> to vector<1x64x8xf32>
    %c0_151 = arith.constant 0 : index
    %c0_152 = arith.constant 0 : index
    %c0_153 = arith.constant 0 : index
    %134 = vector.load %arg18[%c0_151, %c0_152, %c0_153] : memref<1x64x8xf32, #tpu.memory_space<vmem>>, vector<1x64x8xf32>
    tpu.vector_store %arg18[%c0_151, %c0_152, %c0_153], %133 {strides = array<i32>} : memref<1x64x8xf32, #tpu.memory_space<vmem>>, vector<1x64x8xf32>,
    return
  }
  func.func @transform_0(%arg0: i32) -> (i32, i32, i32, i32) {
    %c0_i32 = arith.constant 0 : i32
    %c0_i32_0 = arith.constant 0 : i32
    %c0_i32_1 = arith.constant 0 : i32
    %c0_i32_2 = arith.constant 0 : i32
    return %arg0, %c0_i32, %c0_i32_0, %c0_i32_1 : i32, i32, i32, i32
  }
  func.func @transform_1(%arg0: i32) -> (i32, i32, i32, i32) {
    %c0_i32 = arith.constant 0 : i32
    %c0_i32_0 = arith.constant 0 : i32
    %c0_i32_1 = arith.constant 0 : i32
    %c0_i32_2 = arith.constant 0 : i32
    return %arg0, %c0_i32, %c0_i32_0, %c0_i32_1 : i32, i32, i32, i32
  }
  func.func @transform_2(%arg0: i32) -> (i32, i32, i32, i32) {
    %c0_i32 = arith.constant 0 : i32
    %c0_i32_0 = arith.constant 0 : i32
    %c0_i32_1 = arith.constant 0 : i32
    %c0_i32_2 = arith.constant 0 : i32
    return %arg0, %c0_i32, %c0_i32_0, %c0_i32_1 : i32, i32, i32, i32
  }
  func.func @transform_3(%arg0: i32) -> (i32, i32, i32, i32) {
    %c0_i32 = arith.constant 0 : i32
    %c0_i32_0 = arith.constant 0 : i32
    %c0_i32_1 = arith.constant 0 : i32
    %c0_i32_2 = arith.constant 0 : i32
    return %arg0, %c0_i32, %c0_i32_0, %c0_i32_1 : i32, i32, i32, i32
  }
  func.func @transform_4(%arg0: i32) -> (i32, i32, i32, i32) {
    %c0_i32 = arith.constant 0 : i32
    %c0_i32_0 = arith.constant 0 : i32
    %c0_i32_1 = arith.constant 0 : i32
    %c0_i32_2 = arith.constant 0 : i32
    return %arg0, %c0_i32, %c0_i32_0, %c0_i32_1 : i32, i32, i32, i32
  }
  func.func @transform_5(%arg0: i32) -> (i32, i32, i32, i32) {
    %c0_i32 = arith.constant 0 : i32
    %c0_i32_0 = arith.constant 0 : i32
    %c0_i32_1 = arith.constant 0 : i32
    %c0_i32_2 = arith.constant 0 : i32
    return %arg0, %c0_i32, %c0_i32_0, %c0_i32_1 : i32, i32, i32, i32
  }
  func.func @transform_6(%arg0: i32) -> (i32, i32) {
    %c0_i32 = arith.constant 0 : i32
    %c0_i32_0 = arith.constant 0 : i32
    %c0_i32_1 = arith.constant 0 : i32
    return %c0_i32, %c0_i32_0 : i32, i32
  }
  func.func @transform_7(%arg0: i32) -> (i32, i32) {
    %c0_i32 = arith.constant 0 : i32
    %c0_i32_0 = arith.constant 0 : i32
    %c0_i32_1 = arith.constant 0 : i32
    return %c0_i32, %c0_i32_0 : i32, i32
  }
  func.func @transform_8(%arg0: i32) -> (i32, i32) {
    %c0_i32 = arith.constant 0 : i32
    %c0_i32_0 = arith.constant 0 : i32
    %c0_i32_1 = arith.constant 0 : i32
    return %c0_i32, %c0_i32_0 : i32, i32
  }
  func.func @transform_9(%arg0: i32) -> (i32, i32) {
    %c0_i32 = arith.constant 0 : i32
    %c0_i32_0 = arith.constant 0 : i32
    %c0_i32_1 = arith.constant 0 : i32
    return %c0_i32, %c0_i32_0 : i32, i32
  }
  func.func @transform_10(%arg0: i32) -> (i32, i32) {
    %c0_i32 = arith.constant 0 : i32
    %c0_i32_0 = arith.constant 0 : i32
    %c0_i32_1 = arith.constant 0 : i32
    return %c0_i32, %c0_i32_0 : i32, i32
  }
  func.func @transform_11(%arg0: i32) -> (i32, i32) {
    %c0_i32 = arith.constant 0 : i32
    %c0_i32_0 = arith.constant 0 : i32
    %c0_i32_1 = arith.constant 0 : i32
    return %c0_i32, %c0_i32_0 : i32, i32
  }
  func.func @transform_12(%arg0: i32) -> (i32, i32) {
    %c0_i32 = arith.constant 0 : i32
    %c0_i32_0 = arith.constant 0 : i32
    %c0_i32_1 = arith.constant 0 : i32
    return %c0_i32, %c0_i32_0 : i32, i32
  }
  func.func @transform_13(%arg0: i32) -> (i32, i32) {
    %c0_i32 = arith.constant 0 : i32
    %c0_i32_0 = arith.constant 0 : i32
    %c0_i32_1 = arith.constant 0 : i32
    return %c0_i32, %c0_i32_0 : i32, i32
  }
  func.func @transform_14(%arg0: i32) -> (i32, i32, i32) {
    %c0_i32 = arith.constant 0 : i32
    %c0_i32_0 = arith.constant 0 : i32
    %c0_i32_1 = arith.constant 0 : i32
    return %arg0, %c0_i32, %c0_i32_0 : i32, i32, i32
  }
  func.func @transform_15(%arg0: i32) -> (i32, i32, i32) {
    %c0_i32 = arith.constant 0 : i32
    %c0_i32_0 = arith.constant 0 : i32
    %c0_i32_1 = arith.constant 0 : i32
    return %arg0, %c0_i32, %c0_i32_0 : i32, i32, i32
  }
  func.func @transform_16(%arg0: i32) -> (i32, i32, i32) {
    %c0_i32 = arith.constant 0 : i32
    %c0_i32_0 = arith.constant 0 : i32
    %c0_i32_1 = arith.constant 0 : i32
    return %arg0, %c0_i32, %c0_i32_0 : i32, i32, i32
  }
  func.func @transform_17(%arg0: i32) -> (i32, i32, i32) {
    %c0_i32 = arith.constant 0 : i32
    %c0_i32_0 = arith.constant 0 : i32
    %c0_i32_1 = arith.constant 0 : i32
    return %arg0, %c0_i32, %c0_i32_0 : i32, i32, i32
  }
}

</mosaic_0001>

<bundles_post_ra>
// kernel: vae_stage_forward.1
= control target key start
LH: loop header
LB: loop body
LE: loop exit
PB: predicated region body
PF: predicated region fallthrough
CT: control target
= control target key end

     0   :  { %s4281_s0 = inlined_call_operand.hbm [shape: f32[2,8,8,8], index: 0, kind: input, shape index: {}]   ;;  %s4282_s1 = inlined_call_operand.hbm [shape: f32[2,8,8,8], index: 1, kind: input, shape index: {}]   ;;  %s4283_s2 = inlined_call_operand.vmem [shape: f32[2,8,8,8], index: 2, kind: input, shape index: {}]   ;;  %s4284_s3 = inlined_call_operand.hbm [shape: f32[2,8,8,8], index: 3, kind: input, shape index: {}]   ;;  %s4285_s4 = inlined_call_operand.hbm [shape: f32[2,8,8,8], index: 4, kind: input, shape index: {}]   ;;  %s4286_s5 = inlined_call_operand.hbm [shape: f32[2,8,8,8], index: 5, kind: input, shape index: {}]   ;;  %s4287_s6 = inlined_call_operand.vmem [shape: f32[8,16], index: 6, kind: input, shape index: {}]   ;;  %s4288_s7 = inlined_call_operand.vmem [shape: f32[1,16], index: 7, kind: input, shape index: {}]   ;;  %s4289_s8 = inlined_call_operand.vmem [shape: f32[8,8], index: 8, kind: input, shape index: {}]   ;;  %s4290_s9 = inlined_call_operand.vmem [shape: f32[1,8], index: 9, kind: input, shape index: {}]   ;;  %s4291_s10 = inlined_call_operand.vmem [shape: f32[72,8], index: 10, kind: input, shape index: {}]   ;;  %s4292_s11 = inlined_call_operand.vmem [shape: f32[1,8], index: 11, kind: input, shape index: {}]   ;;  %s4293_s12 = inlined_call_operand.vmem [shape: f32[72,8], index: 12, kind: input, shape index: {}]   ;;  %s4294_s13 = inlined_call_operand.vmem [shape: f32[1,8], index: 13, kind: input, shape index: {}]   ;;  %s4295_s14 = inlined_call_operand.vmem [shape: f32[2,1,128], index: 14, kind: output, shape index: {0}]   ;;  %s4296_s15 = inlined_call_operand.vmem [shape: f32[2,64,16], index: 15, kind: output, shape index: {1}]   ;;  %s4297_s16 = inlined_call_operand.hbm [shape: f32[2,64,8], index: 16, kind: output, shape index: {2}]   ;;  %s4298_s17 = inlined_call_operand.vmem [shape: f32[2,64,8], index: 17, kind: output, shape index: {3}]  }
   0x1   :  { %4316 = sst [smem:[#allocation24_spill]] %s4281_s0 }
   0x2   :  { %4317 = sst [smem:[#allocation25_spill]] %s4282_s1 }
   0x3   :  { %4318 = sst [smem:[#allocation26_spill]] %s4285_s4 }
   0x4   :  { %4319 = sst [smem:[#allocation27_spill]] %s4287_s6 }
   0x5   :  { %4320 = sst [smem:[#allocation28_spill]] %s4288_s7 }
   0x6   :  { %4321 = sst [smem:[#allocation29_spill]] %s4290_s9 }
   0x7   :  { %4322 = sst [smem:[#allocation30_spill]] %s4291_s10 }
   0x8   :  { %4323 = sst [smem:[#allocation31_spill]] %s4292_s11 }
   0x9   :  { %4324 = sst [smem:[#allocation32_spill]] %s4293_s12 }
   0xa   :  { %4325 = sst [smem:[#allocation33_spill]] %s4294_s13 }
   0xb   :  { %4326 = sst [smem:[#allocation34_spill]] %s4295_s14 }
   0xc   :  { %4327 = sst [smem:[#allocation35_spill]] %s4296_s15 }
   0xd   :  { %4328 = sst [smem:[#allocation36_spill]] %s4297_s16 }
   0xe   :  { %4329 = sst [smem:[#allocation37_spill]] %s4298_s17 }
   0xf   :  { %23 = vsyncpa [#allocation5], 0 }
  0x10   :  { %25 = vsyncpa [#allocation5 + $0x1], 0 }
  0x11   :  { %26 = vsyncpa [#allocation8], 0 }
  0x12   :  { %28 = vsyncpa [#allocation8 + $0x1], 0 }
  0x13   :  { %29 = vsyncpa [#allocation11], 0 }
  0x14   :  { %31 = vsyncpa [#allocation11 + $0x1], 0 }
  0x15   :  { %32 = vsyncpa [#allocation6], 0 }
  0x16   :  { %34 = vsyncpa [#allocation6 + $0x1], 0  ;;  %s3143_s24 = smov 0   ;;  %s3145_s25 = smov 0  }
  0x17   :  { %s3147_s26 = smov 0   ;;  %s3149_s27 = smov 0  }
  0x18 LB: > { %4330 = sst [smem:[#allocation18_spill]] %s3026_s24  ;;  %s3164_s28 = sadd.s32 4294967295, %s3038_s27   ;;  %s3038_s27 = sphi %s3149_s27, %s4364_s27   ;;  %s3034_s26 = sphi %s3147_s26, %s4368_s26   ;;  %s3030_s25 = sphi %s3145_s25, %s4367_s25   ;;  %s3026_s24 = sphi %s3143_s24, %s4366_s24  }
  0x19   : > { %4331 = sst [smem:[#allocation19_spill]] %s3038_s27  ;;  %s2594_s29 = sadd.s32 4294967294, %s3038_s27  }
  0x1a   : > { %s3168_s0 = sadd.s32 1, %s3038_s27   ;;  %s47_s30 = sadd.s32 1, %s3034_s26 }
  0x1b   : > { %4332 = sst [smem:[#allocation20_spill]] %s3168_s0  ;;  %s44_s18 = ssub.s32 %s3038_s27, %s3168_s0 }
  0x1c   : > { %p54_p0 = scmp.ne.s32.totalorder %s3034_s26, %s3030_s25  ;;  %p45_p1 = scmp.eq.s32.totalorder %s44_s18, 0 }
  0x1d   : > { %p55_p2 = scmp.eq.s32.totalorder %s3038_s27, 0  ;;  %p60_p3 = scmp.ne.s32.totalorder %s3030_s25, %s3026_s24 }
  0x1e   : > { %p61_p4 = scmp.eq.s32.totalorder %s3164_s28, 0  ;;  %p434_p7 = scmp.eq.s32.totalorder %s3164_s28, 1 }
  0x1f   : > { %s3180_s19 = scalar_select %p45_p1, %s3034_s26, %s47_s30  }
  0x20   : > { %p56_p5 = por %p55_p2, %p54_p0  ;;  %p3182_p6 = por %p61_p4, %p60_p3 }
  0x21   : > { %4333 = sst [smem:[#allocation21_spill]] %s3180_s19  ;;  %p440_p8 = scmp.eq.s32.totalorder %s2594_s29, 1 }
  0x22   : > { %p2596_p9 = scmp.ge.s32.totalorder %s3038_s27, 2  ;;  %p2731_p10 = scmp.lt.s32.totalorder %s3038_s27, 2 }
  0x23   : > { %p3189_p11 = por %p434_p7, %p54_p0  ;;  %p3193_p12 = por %p440_p8, %p60_p3 }
  0x24   : > { %s4308_s22 = sand.u32 1, %s3034_s26   ;;  %s3199_s23 = sshll.u32 %s3038_s27, 6 }
  0x25   : > { %s4335_s20 = scalar_select %p3189_p11, 1, 0 }
  0x26   : > { %s4337_s21 = scalar_select %p3193_p12, 1, 0 }
  0x27   : > { %4336 = sst [smem:[#allocation22_spill]] %s4335_s20  ;;  %s3203_s30 = sshll.u32 %s4308_s22, 6 }
  0x28   : > { %4338 = sst [smem:[#allocation23_spill]] %s4337_s21  ;;  %p3205_p13 = pnand %p2731_p10, %p56_p5 }
  0x29   : > { %s4310_s18 = sand.u32 1, %s3038_s27   ;;  %s4340_s24 = sld [smem:[#allocation25_spill]] }
  0x2a   : > { %s536_s20 = scalar_lea.vmem [#allocation7], %s3203_s30  ;;  %p2612_p0 = scmp.ge.s32.totalorder %s3038_s27, 1 }
  0x2b   : > { %s544_s21 = sshll.u32 %s536_s20, 4  ;;  %s3218_s22 = scalar_lea.sflag [#allocation8], %s4310_s18  ;;  %s545_s21 = int_to_ptr.vmem [resolvable:$true] %s544_s21 }
  0x2c   : > { %p3222_p2 = pneg %p3205_p13 }
  0x2f   : > { %s4341_s14 = smov %s4340_s24  ;;  %s541_s16 = scalar_lea.hbm %s4340_s24, %s3199_s23 }
  0x30   : > { %s542_s17 = sshll.u32 %s541_s16, 4  ;;  %s2821_s0 = scalar_lea.hbm %s4341_s14, 128  ;;  %s543_s17 = int_to_ptr.hbm [resolvable:$true] %s542_s17 }
  0x31   : > { %s2814_s13 = sshra.s32 %s543_s17, 4  ;;  %s2815_s13 = int_to_ptr.hbm [resolvable:$true] %s2814_s13 }
  0x32   : > { %s2816_s12 = scalar_lea.hbm %s2815_s13, 64  ;;  %p2822_p5 = scmp.lt.s32.totalorder %s2815_s13, %s4341_s14 }
  0x33   : > { %p2817_p1 = scmp.ne.s32.totalorder %s2815_s13, %s2816_s12  ;;  %p2823_p7 = scmp.lt.s32.totalorder %s2821_s0, %s2816_s12 }
  0x35   : > { %p2819_p3 = pnand %p3222_p2, %p2817_p1  ;;  %p2824_p8 = por %p2823_p7, %p2822_p5 }
  0x37   : > { %p2820_p4 = pneg %p2819_p3 }
  0x39   : > { %p2825_p10 = pnand %p2824_p8, %p2820_p4 }
  0x3b   : > { %2828 = shalt.err (!%p2825_p10)
}
  0x3c   : > { %s4313_s18 = smov 128   ;;  %s3041_s10 = smov 8  }
  0x3d   : > { %2717 = dma.hbm_to_vmem [thread:$0]  (!%p3205_p13), %s543_s17, 1024, %s545_s21, %s3218_s22, %s4313_s18, %s4313_s18, %s3041_s10  }
  0x3e   : > { %p626_p1 = scmp.lt.s32.totalorder %s3038_s27, 3  ;;  %s4343_s4 = sld [smem:[#allocation26_spill]] }
  0x3f   : > { %s588_s19 = scalar_lea.vmem [#allocation10], %s3203_s30  ;;  %s4345_s14 = sand.u32 1, %s3038_s27  }
  0x40   : > { %p3247_p3 = pnand %p2612_p0, %p626_p1  ;;  %s596_s20 = sshll.u32 %s588_s19, 4  ;;  %s597_s20 = int_to_ptr.vmem [resolvable:$true] %s596_s20 }
  0x41   : > { %s3254_s15 = scalar_lea.sflag [#allocation11], %s4345_s14 }
  0x44   : > { %s593_s16 = scalar_lea.hbm %s4343_s4, %s3199_s23  ;;  %s2851_s13 = scalar_lea.hbm %s4343_s4, 128 }
  0x45   : > { %s594_s0 = sshll.u32 %s593_s16, 4  ;;  %s595_s0 = int_to_ptr.hbm [resolvable:$true] %s594_s0 }
  0x46   : > { %s2844_s7 = sshra.s32 %s595_s0, 4  ;;  %s2845_s7 = int_to_ptr.hbm [resolvable:$true] %s2844_s7 }
  0x47   : > { %s2846_s17 = scalar_lea.hbm %s2845_s7, 64  ;;  %p2852_p0 = scmp.lt.s32.totalorder %s2845_s7, %s4343_s4 }
  0x48   : > { %p2847_p4 = scmp.ne.s32.totalorder %s2845_s7, %s2846_s17  ;;  %p2853_p8 = scmp.lt.s32.totalorder %s2851_s13, %s2846_s17 }
  0x4a   : > { %p2849_p5 = pnand %p2847_p4, %p3222_p2  ;;  %p2854_p10 = por %p2853_p8, %p2852_p0 }
  0x4c   : > { %p2850_p7 = pneg %p2849_p5 }
  0x4e   : > { %p2855_p1 = pnand %p2854_p10, %p2850_p7 }
  0x50   : > { %2858 = shalt.err (!%p2855_p1)
}
  0x51   : > { %s4346_s14 = smov 128   ;;  %s4347_s12 = sld [smem:[#allocation24_spill]] }
  0x52   : > { %2723 = dma.hbm_to_vmem [thread:$0]  (!%p3205_p13), %s595_s0, 1024, %s597_s20, %s3254_s15, %s4346_s14, %s4346_s14, %s3041_s10  }
  0x53   : > { %s514_s17 = scalar_lea.vmem [#allocation4], %s3203_s30  ;;  %s4348_s16 = sand.u32 1, %s3034_s26  }
  0x54   : > { %s522_s13 = sshll.u32 %s514_s17, 4  ;;  %s511_s4 = scalar_lea.sflag [#allocation5], %s4348_s16  ;;  %s523_s13 = int_to_ptr.vmem [resolvable:$true] %s522_s13 }
  0x57   : > { %s519_s18 = scalar_lea.hbm %s4347_s12, %s3199_s23  ;;  %s2881_s20 = scalar_lea.hbm %s4347_s12, 128 }
  0x58   : > { %s520_s7 = sshll.u32 %s519_s18, 4  ;;  %s521_s7 = int_to_ptr.hbm [resolvable:$true] %s520_s7 }
  0x59   : > { %s2874_s27 = sshra.s32 %s521_s7, 4  ;;  %s2875_s27 = int_to_ptr.hbm [resolvable:$true] %s2874_s27 }
  0x5a   : > { %s2876_s9 = scalar_lea.hbm %s2875_s27, 64  ;;  %p2882_p0 = scmp.lt.s32.totalorder %s2875_s27, %s4347_s12 }
  0x5b   : > { %p2877_p4 = scmp.ne.s32.totalorder %s2875_s27, %s2876_s9  ;;  %p2883_p8 = scmp.lt.s32.totalorder %s2881_s20, %s2876_s9 }
  0x5d   : > { %p2879_p5 = pnand %p2877_p4, %p3222_p2  ;;  %p2884_p10 = por %p2883_p8, %p2882_p0 }
  0x5f   : > { %p2880_p7 = pneg %p2879_p5 }
  0x61   : > { %p2885_p1 = pnand %p2884_p10, %p2880_p7 }
  0x63   : > { %2888 = shalt.err (!%p2885_p1)
}
  0x64   : > { %2714 = dma.hbm_to_vmem [thread:$0]  (!%p3205_p13), %s521_s7, 1024, %s523_s13, %s511_s4, %s4346_s14, %s4346_s14, %s3041_s10  }
  0x65   : > { %s571_s17 = scalar_lea.hbm %s4284_s3, %s3199_s23  ;;  %s566_s0 = scalar_lea.vmem [#allocation9], %s3203_s30 }
  0x66   : > { %s572_s16 = sshll.u32 %s571_s17, 4  ;;  %s574_s27 = sshll.u32 %s566_s0, 4  ;;  %s573_s16 = int_to_ptr.hbm [resolvable:$true] %s572_s16  ;;  %s575_s27 = int_to_ptr.vmem [resolvable:$true] %s574_s27 }
  0x67   : > { %s2904_s9 = sshra.s32 %s573_s16, 4  ;;  %s2911_s4 = scalar_lea.hbm %s4284_s3, 128  ;;  %s2905_s9 = int_to_ptr.hbm [resolvable:$true] %s2904_s9 }
  0x68   : > { %s2906_s20 = scalar_lea.hbm %s2905_s9, 64  ;;  %p2912_p0 = scmp.lt.s32.totalorder %s2905_s9, %s4284_s3 }
  0x69   : > { %p2907_p4 = scmp.ne.s32.totalorder %s2905_s9, %s2906_s20  ;;  %p2913_p8 = scmp.lt.s32.totalorder %s2911_s4, %s2906_s20 }
  0x6b   : > { %p2909_p5 = pnand %p2907_p4, %p3222_p2  ;;  %p2914_p10 = por %p2913_p8, %p2912_p0 }
  0x6d   : > { %p2910_p7 = pneg %p2909_p5 }
  0x6f   : > { %p2915_p1 = pnand %p2914_p10, %p2910_p7 }
  0x71   : > { %2918 = shalt.err (!%p2915_p1)
}
  0x72   : > { %2720 = dma.hbm_to_vmem [thread:$0]  (!%p3205_p13), %s573_s16, 1024, %s575_s27, %s3218_s22, %s4346_s14, %s4346_s14, %s3041_s10  }
  0x73   : > { %s615_s17 = scalar_lea.hbm %s4286_s5, %s3199_s23  ;;  %s610_s9 = scalar_lea.vmem [#allocation12], %s3203_s30 }
  0x74   : > { %s616_s0 = sshll.u32 %s615_s17, 4  ;;  %s618_s20 = sshll.u32 %s610_s9, 4  ;;  %s617_s0 = int_to_ptr.hbm [resolvable:$true] %s616_s0  ;;  %s619_s20 = int_to_ptr.vmem [resolvable:$true] %s618_s20 }
  0x75   : > { %s2934_s19 = sshra.s32 %s617_s0, 4  ;;  %s2941_s22 = scalar_lea.hbm %s4286_s5, 128  ;;  %s2935_s19 = int_to_ptr.hbm [resolvable:$true] %s2934_s19 }
  0x76   : > { %s2936_s21 = scalar_lea.hbm %s2935_s19, 64  ;;  %p2942_p0 = scmp.lt.s32.totalorder %s2935_s19, %s4286_s5 }
  0x77   : > { %p2937_p4 = scmp.ne.s32.totalorder %s2935_s19, %s2936_s21  ;;  %p2943_p8 = scmp.lt.s32.totalorder %s2941_s22, %s2936_s21 }
  0x79   : > { %p2939_p5 = pnand %p2937_p4, %p3222_p2  ;;  %p2944_p10 = por %p2943_p8, %p2942_p0 }
  0x7b   : > { %p2940_p7 = pneg %p2939_p5 }
  0x7d   : > { %p2945_p1 = pnand %p2944_p10, %p2940_p7 }
  0x7f   : > { %2948 = shalt.err (!%p2945_p1)
}
  0x80   : > { %2726 = dma.hbm_to_vmem [thread:$0]  (!%p3205_p13), %s617_s0, 1024, %s619_s20, %s3254_s15, %s4346_s14, %s4346_s14, %s3041_s10  }
  0x81   : > { %630 = sbr.rel (%p3247_p3) target bundleno = 1083 (0x43b), region = 76  ;;  %s3331_s11 = sand.u32 (!%p3247_p3), 1, %s3030_s25  }
  0x82   : > { %s3334_s23 = sshll.u32 (!%p3247_p3), %s3331_s11, 6  ;;  %s633_s30 = scalar_lea.sflag (!%p3247_p3), [#allocation5], %s3331_s11 }
  0x83   : > { %s3338_s13 = scalar_lea.vmem (!%p3247_p3), [#allocation4], %s3334_s23 }
  0x86   : > { %3009 = dma.done.wait (%p3182_p6), %s633_s30, 1024  }
  0x87   : > { %3011 = vsyncadd (%p3182_p6), %s633_s30, 4294966272  ;;  %s642_s10 = sand.u32 1, %s3164_s28   ;;  %s3346_s29 = scalar_lea.vmem [#allocation7], %s3334_s23 }
  0x88   : > { %s643_s15 = scalar_lea.sflag [#allocation8], %s642_s10 }
  0x89   : > { %3013 = dma.done.wait (%p3182_p6), %s643_s15, 2048  }
  0x8a   : > { %3015 = vsyncadd (%p3182_p6), %s643_s15, 4294965248  ;;  %s3353_s24 = scalar_lea.vmem [#allocation9], %s3334_s23  ;;  %s663_s14 = scalar_lea.sflag [#allocation11], %s642_s10 }
  0x8b   : > { %s3356_s18 = scalar_lea.vmem [#allocation10], %s3334_s23 }
  0x8c   : > { %3017 = dma.done.wait (%p3182_p6), %s663_s14, 2048  }
  0x8d   : > { %3019 = vsyncadd (%p3182_p6), %s663_s14, 4294965248  ;;  %p766_p13 = scmp.lt.s32.totalorder %s3164_s28, 1  ;;  %vm797_vm0 = vcmask 64512   ;;  %v1154_v0 = vld [vmem:[%s4289_s8] sm:$0xff]  ;;  %s4349_s7 = sld [smem:[#allocation27_spill]]  ;;  %v1147_v6 = vld [vmem:[%s3353_s24 + $0x8] sm:$0xff] }
  0x8e   : > { %v1146_v1 = vld [vmem:[%s3353_s24] sm:$0xff]  ;;  %1198 = vmatpush.msra.mxu1 %v1154_v0  ;;  %s3042_s22 = smov 8   ;;  %v785_v7 = vld [vmem:[%s3338_s13 + $0x8] sm:$0xff]  ;;  %v1148_v9 = vld [vmem:[%s3353_s24 + $0x10] sm:$0xff]  ;;  %vm1225_vm1 = vcmask 58368   ;;  %v3043_v17 = vmov 0.0  }
  0x8f   : > { %s3364_s6 = scalar_select %p766_p13, %s3164_s28, 1  ;;  %v784_v3 = vld [vmem:[%s3338_s13] sm:$0xff]  ;;  %2641 = vmatmul.msk.f32.vlgmr.msra.gmra.mxu1 %vm797_vm0, %v1146_v1  ;;  %v786_v10 = vld [vmem:[%s3338_s13 + $0x10] sm:$0xff]  ;;  %v1149_v12 = vld [vmem:[%s3353_s24 + $0x18] sm:$0xff]  ;;  %1224 = vst.msk [vmem:[#allocation2] sm:$0xff] %vm797_vm0, %v3043_v17  ;;  %vm1137_vm2 = vcmask 130048  }
  0x90   : > { %v787_v13 = vld [vmem:[%s3338_s13 + $0x18] sm:$0xff]  ;;  %1226 = vst.msk [vmem:[#allocation2 + $0x8] sm:$0x3] %vm1225_vm1, %v3043_v17  ;;  %v1150_v18 = vld [vmem:[%s3353_s24 + $0x20] sm:$0xff]  ;;  %s3044_s16 = smov 16   ;;  %v1151_v22 = vld [vmem:[%s3353_s24 + $0x28] sm:$0xff] }
  0x91   : > { %s3367_s17 = sshll.u32 %s3364_s6, 6  ;;  %1227 = vst.msk [vmem:[#allocation2 + $0x10] sm:$0xff] %vm797_vm0, %v3043_v17  ;;  %v788_v19 = vld [vmem:[%s3338_s13 + $0x20] sm:$0xff]  ;;  %v789_v23 = vld [vmem:[%s3338_s13 + $0x28] sm:$0xff]  ;;  %v790_v24 = vld [vmem:[%s3338_s13 + $0x30] sm:$0xff]  ;;  %s4350_s10 = sld [smem:[#allocation29_spill]] }
  0x92   : > { %s3373_s20 = scalar_lea.vmem %s4283_s2, %s3367_s17  ;;  %1228 = vst.msk [vmem:[#allocation2 + $0x18] sm:$0x3] %vm1225_vm1, %v3043_v17  ;;  %v791_v25 = vld [vmem:[%s3338_s13 + $0x38] sm:$0xff]  ;;  %v1152_v26 = vld [vmem:[%s3353_s24 + $0x30] sm:$0xff]  ;;  %s4351_s14 = sld [smem:[#allocation28_spill]]  ;;  %v1245_v33 = vld [vmem:[%s3356_s18] sm:$0xff] }
  0x93   : > { %v792_v2 = vld [vmem:[%s4349_s7] sm:$0xff]  ;;  %v3391_v5 = vld [vmem:[%s3373_s20 + $0x10] sm:$0xff]  ;;  %v3398_v8 = vld [vmem:[%s3373_s20 + $0x8] sm:$0xff]  ;;  %1229 = vst.msk [vmem:[#allocation2 + $0x20] sm:$0xff] %vm797_vm0, %v3043_v17  ;;  %s3045_s1 = smov 40   ;;  %s3046_s19 = smov 24  }
  0x94   : > { %837 = vmatpush.msra.mxu0 %v792_v2  ;;  %v3385_v4 = vld [vmem:[%s3373_s20] sm:$0xff]  ;;  %891 = vrot.lane.b32.xlu1 %v3391_v5, %s3042_s22  ;;  %v3409_v11 = vld [vmem:[%s3373_s20 + $0x18] sm:$0xff]  ;;  %v3421_v15 = vld [vmem:[%s3373_s20 + $0x30] sm:$0xff]  ;;  %1230 = vst.msk [vmem:[#allocation2 + $0x28] sm:$0x3] %vm1225_vm1, %v3043_v17  ;;  %s3047_s21 = smov 32  }
  0x95   : > { %2625 = vmatmul.msk.f32.vlgmr.msra.gmra.mxu0 %vm797_vm0, %v784_v3  ;;  %887 = vrot.lane.b32.xlu0 %v3385_v4, %s3042_s22  ;;  %v3418_v14 = vld [vmem:[%s3373_s20 + $0x38] sm:$0xff]  ;;  %v3424_v16 = vld [vmem:[%s3373_s20 + $0x20] sm:$0xff]  ;;  %1231 = vst.msk [vmem:[#allocation2 + $0x30] sm:$0xff] %vm797_vm0, %v3043_v17  ;;  %v3475_v27 = vld [vmem:[%s3373_s20 + $0x28] sm:$0xff]  ;;  %v919_v29 = vmul.f32 1.442695, %v3385_v4 }
  0x96   : > { %895 = vrot.lane.b32.xlu2 %v3424_v16, %s3042_s22  ;;  %1232 = vst.msk [vmem:[#allocation2 + $0x38] sm:$0x3] %vm1225_vm1, %v3043_v17  ;;  %v1153_v28 = vld [vmem:[%s3353_s24 + $0x38] sm:$0xff]  ;;  %s4352_s24 = sld [smem:[#allocation35_spill]]  ;;  %v863_v36 = vld [vmem:[%s3346_s29] sm:$0xff]  ;;  %v1246_v44 = vld [vmem:[%s3356_s18 + $0x8] sm:$0xff] }
  0x97   : > { %2642 = vmatmul.msk.f32.gmra.mxu1 %vm797_vm0, %v1147_v6  ;;  %v3444_v20 = vld [vmem:[#allocation2 + $0x1] sm:$0xff]  ;;  %1233 = vst.msk [vmem:[#allocation2 + $0x40] sm:$0xff] %vm797_vm0, %v3043_v17  ;;  %v3485_v30 = vld [vmem:[%s4350_s10] ss:$0 sm:$0xff]  ;;  %2782 = vpow2.f32 %v919_v29  ;;  %v921_v38 = vmul.f32 1.442695, %v3398_v8 }
  0x98   : > { %v3447_v21 = vld [vmem:[#allocation2 + $0x2] sm:$0xff]  ;;  %1234 = vst.msk [vmem:[#allocation2 + $0x48] sm:$0x3] %vm1225_vm1, %v3043_v17  ;;  %v3490_v31 = vld [vmem:[%s4351_s14] ss:$0 sm:$0xff]  ;;  %v1247_v60 = vld [vmem:[%s3356_s18 + $0x10] sm:$0xff] }
  0x99   : > { %1235 = vst.msk [vmem:[#allocation2 + $0x50] sm:$0xff] %vm797_vm0, %v3043_v17  ;;  %2784 = vpow2.f32 %v921_v38  ;;  %v864_v48 = vld [vmem:[%s3346_s29 + $0x8] sm:$0xff]  ;;  %v923_v1 = vmul.f32 1.442695, %v3391_v5  ;;  %v1248_v6 = vld [vmem:[%s3356_s18 + $0x18] sm:$0xff]  ;;  %s3048_s4 = smov 120  }
  0x9a   : > { %1236 = vst.msk [vmem:[#allocation2 + $0x58] sm:$0x3] %vm1225_vm1, %v3043_v17  ;;  %s3049_s7 = smov 56   ;;  %s3050_s27 = smov 64   ;;  %vm1334_vm3 = vcmask 130112   ;;  %vm1383_vm4 = vcmask 195712  }
  0x9b   : > { %1237 = vst.msk [vmem:[#allocation2 + $0x60] sm:$0xff] %vm797_vm0, %v3043_v17  ;;  %s3051_s30 = smov 48   ;;  %s4353_s15 = sld [smem:[#allocation30_spill]]  ;;  %vm1432_vm5 = vcmask 261312   ;;  %vm1481_vm6 = vcmask 326912   ;;  %vm1530_vm7 = vcmask 392512  }
  0x9c   : > { %893 = vrot.lane.b32.xlu1 %v3409_v11, %s3042_s22  ;;  %1238 = vst.msk [vmem:[#allocation2 + $0x68] sm:$0x3] %vm1225_vm1, %v3043_v17  ;;  %s3497_s20 = scalar_lea.vmem %s4352_s24, %s3367_s17  ;;  %vm1580_vm8 = vcmask 458112   ;;  %vm1629_vm9 = vcmask 523712   ;;  %vm1678_vm10 = vcmask 589312   ;;  %vm1708_vm11 = vcmask 588800  }
  0x9d   : > { %2626 = vmatmul.msk.f32.gmra.mxu0 %vm797_vm0, %v785_v7  ;;  %889 = vrot.lane.b32.xlu0 %v3398_v8, %s3042_s22  ;;  %1239 = vst.msk [vmem:[#allocation2 + $0x70] sm:$0xff] %vm797_vm0, %v3043_v17  ;;  %v2783_v41 = vpop.eup %2782  ;;  %s4354_s9 = sld [smem:[#allocation31_spill]]  ;;  %s3875_s24 = scalar_lea.vmem [#allocation13], %s3334_s23 }
  0x9e   : > { %1240 = vst.msk [vmem:[#allocation2 + $0x78] sm:$0x3] %vm1225_vm1, %v3043_v17  ;;  %897 = vrot.lane.b32.xlu2 %v3475_v27, %s3042_s22  ;;  %s4355_s10 = sld [smem:[#allocation32_spill]] }
  0x9f   : > { %2643 = vmatmul.msk.f32.gmra.mxu1 %vm797_vm0, %v1148_v9  ;;  %1241 = vst.msk [vmem:[#allocation2 + $0x80] sm:$0xff] %vm797_vm0, %v3043_v17  ;;  %v2785_v56 = vpop.eup %2784  ;;  %s4359_s0 = sld [smem:[#allocation36_spill]] }
  0xa0   : > { %1242 = vst.msk [vmem:[#allocation2 + $0x88] sm:$0x3] %vm1225_vm1, %v3043_v17 }
  0xa1   : > { %1243 = vst.msk [vmem:[#allocation2 + $0x90] sm:$0xff] %vm797_vm0, %v3043_v17 }
  0xa2   : > { %1244 = vst.msk [vmem:[#allocation2 + $0x98] sm:$0x3] %vm1225_vm1, %v3043_v17  ;;  %v865_v17 = vld [vmem:[%s3346_s29 + $0x10] sm:$0xff] }
  0xa4   : > { %901 = vrot.lane.b32.xlu1 %v3418_v14, %s3042_s22 }
  0xa5   : > { %2627 = vmatmul.msk.f32.gmra.mxu0 %vm797_vm0, %v786_v10  ;;  %899 = vrot.lane.b32.xlu0 %v3421_v15, %s3042_s22 }
  0xa7   : > { %2644 = vmatmul.msk.f32.gmra.mxu1 %vm797_vm0, %v1149_v12 }
  0xac   : > { %1310 = vrot.lane.b32.xlu1 %v3444_v20, %s3042_s22 }
  0xad   : > { %2628 = vmatmul.msk.f32.gmra.mxu0 %vm797_vm0, %v787_v13  ;;  %1359 = vrot.lane.b32.xlu0 %v3447_v21, %s3044_s16 }
  0xaf   : > { %2645 = vmatmul.msk.f32.gmra.mxu1 %vm797_vm0, %v1150_v18 }
  0xb5   : > { %2629 = vmatmul.msk.f32.gmra.mxu0 %vm797_vm0, %v788_v19 }
  0xb7   : > { %2646 = vmatmul.msk.f32.gmra.mxu1 %vm797_vm0, %v1151_v22 }
  0xbd   : > { %2630 = vmatmul.msk.f32.gmra.mxu0 %vm797_vm0, %v789_v23 }
  0xbf   : > { %2647 = vmatmul.msk.f32.gmra.mxu1 %vm797_vm0, %v1152_v26 }
  0xc5   : > { %2631 = vmatmul.msk.f32.gmra.mxu0 %vm797_vm0, %v790_v24 }
  0xc7   : > { %2648 = vmatmul.msk.f32.gmra.mxu1 %vm797_vm0, %v1153_v28 }
  0xcd   : > { %2632 = vmatmul.msk.f32.gmra.mxu0 %vm797_vm0, %v791_v25 }
 0x10c   : > { %v1200_v32 = vpop.f32.mrf.mxu1 }
 0x10d   : > { %v1201_v34 = vadd.f32 %v3485_v30, %v1200_v32  ;;  %v3571_v32 = vpop.permute.xlu1 %891 }
 0x10f   : > { %v1261_v39 = vadd.f32 %v1245_v33, %v1201_v34  ;;  %v1249_v34 = vld [vmem:[%s3356_s18 + $0x20] sm:$0xff] }
 0x111   : > { %1270 = vst.msk [vmem:[#allocation2 + $0x11] sm:$0xff] %vm797_vm0, %v1261_v39 }
 0x112   : > { %v839_v35 = vpop.f32.mrf.mxu0 }
 0x113   : > { %v3502_v37 = vadd.f32 %v3490_v31, %v839_v35 }
 0x114   : > { %v1203_v43 = vpop.f32.mrf.mxu1 }
 0x115   : > { %1138 = vst.msk [vmem:[%s3497_s20] sm:$0xff] %vm1137_vm2, %v3502_v37  ;;  %v935_v40 = vsub.f32 %v863_v36, %v3502_v37  ;;  %v1204_v46 = vadd.f32 %v3485_v30, %v1203_v43  ;;  %v959_v53 = vsub.f32 0.0, %v3502_v37  ;;  %v3589_v43 = vpop.permute.xlu1 %893 }
 0x117   : > { %v943_v42 = vmul.f32 %v935_v40, %v935_v40  ;;  %v1262_v50 = vadd.f32 %v1246_v44, %v1204_v46  ;;  %v967_v58 = vmul.f32 1.442695, %v959_v53  ;;  %v3583_v40 = vpop.permute.xlu0 %887 }
 0x118   : > { %v1344_v51 = vld [vmem:[#allocation2 + $0x12] sm:$0xff] }
 0x119   : > { %v3511_v45 = vadd.f32 %v2783_v41, %v943_v42  ;;  %v1295_v52 = vld [vmem:[#allocation2 + $0x11] sm:$0xff]  ;;  %1271 = vst.msk [vmem:[#allocation2 + $0x21] sm:$0xff] %vm797_vm0, %v1262_v50  ;;  %1361 = vrot.lane.b32.xlu2 %v1344_v51, %s3044_s16  ;;  %1506 = vrot.lane.b32.xlu0 %v1344_v51, %s3045_s1  ;;  %2786 = vpow2.f32 %v967_v58 }
 0x11a   : > { %v842_v47 = vpop.f32.mrf.mxu0  ;;  %v1392_v54 = vld [vmem:[#allocation2 + $0x10] sm:$0xff]  ;;  %1312 = vrot.lane.b32.xlu1 %v1295_v52, %s3042_s22  ;;  %2788 = vpow2.f32 %v923_v1  ;;  %v927_v1 = vmul.f32 1.442695, %v3424_v16 }
 0x11b   : > { %v3516_v49 = vadd.f32 %v3490_v31, %v842_v47  ;;  %1287 = vst.msk [vmem:[#allocation3 + $0x8] sm:$0xff] %vm797_vm0, %v1392_v54 }
 0x11c   : > { %v1206_v59 = vpop.f32.mrf.mxu1 }
 0x11d   : > { %1139 = vst.msk [vmem:[%s3497_s20 + $0x8] sm:$0xff] %vm1137_vm2, %v3516_v49  ;;  %v936_v55 = vsub.f32 %v864_v48, %v3516_v49  ;;  %v1207_v62 = vadd.f32 %v3485_v30, %v1206_v59  ;;  %v960_v2 = vsub.f32 0.0, %v3516_v49 }
 0x11f   : > { %v944_v57 = vmul.f32 %v936_v55, %v936_v55  ;;  %v1263_v63 = vadd.f32 %v1247_v60, %v1207_v62  ;;  %v969_v7 = vmul.f32 1.442695, %v960_v2  ;;  %v2787_v9 = vpop.eup %2786  ;;  %v3601_v51 = vpop.permute.xlu0 %889  ;;  %v925_v55 = vmul.f32 1.442695, %v3409_v11  ;;  %v1250_v60 = vld [vmem:[%s3356_s18 + $0x28] sm:$0xff]  ;;  %v3621_v62 = vld [vmem:[#allocation2] sm:$0xff] }
 0x120   : > { %v1393_v0 = vld [vmem:[#allocation2 + $0x20] sm:$0xff]  ;;  %v2789_v19 = vpop.eup %2788  ;;  %1286 = vst.msk [vmem:[#allocation3] sm:$0xff] %vm797_vm0, %v3621_v62 }
 0x121   : > { %v3529_v61 = vadd.f32 %v2785_v56, %v944_v57  ;;  %1408 = vrot.lane.b32.xlu2 %v1392_v54, %s3046_s19  ;;  %1272 = vst.msk [vmem:[#allocation2 + $0x31] sm:$0xff] %vm797_vm0, %v1263_v63  ;;  %1410 = vrot.lane.b32.xlu0 %v1393_v0, %s3046_s19  ;;  %v1442_v12 = vld [vmem:[#allocation2 + $0x21] sm:$0xff]  ;;  %2790 = vpow2.f32 %v969_v7 }
 0x122   : > { %1457 = vrot.lane.b32.xlu1 %v1295_v52, %s3047_s21  ;;  %v845_v3 = vpop.f32.mrf.mxu0  ;;  %1288 = vst.msk [vmem:[#allocation3 + $0x10] sm:$0xff] %vm797_vm0, %v1393_v0  ;;  %v1491_v25 = vld [vmem:[#allocation2 + $0x22] sm:$0xff]  ;;  %v3604_v52 = vpop.permute.xlu1 %901 }
 0x123   : > { %v3540_v4 = vadd.f32 %v3490_v31, %v845_v3  ;;  %v866_v3 = vld [vmem:[%s3346_s29 + $0x18] sm:$0xff] }
 0x124   : > { %v1209_v5 = vpop.f32.mrf.mxu1 }
 0x125   : > { %1140 = vst.msk [vmem:[%s3497_s20 + $0x10] sm:$0xff] %vm1137_vm2, %v3540_v4  ;;  %v1210_v8 = vadd.f32 %v3485_v30, %v1209_v5  ;;  %v937_v18 = vsub.f32 %v865_v17, %v3540_v4  ;;  %v961_v42 = vsub.f32 0.0, %v3540_v4 }
 0x127   : > { %v1264_v10 = vadd.f32 %v1248_v6, %v1210_v8  ;;  %v945_v22 = vmul.f32 %v937_v18, %v937_v18  ;;  %v2791_v24 = vpop.eup %2790  ;;  %v971_v46 = vmul.f32 1.442695, %v961_v42  ;;  %v3618_v58 = vpop.permute.xlu0 %899  ;;  %v868_v42 = vld [vmem:[%s3346_s29 + $0x28] sm:$0xff] }
 0x128   : > { %v1541_v13 = vld [vmem:[#allocation2 + $0x30] sm:$0xff] }
 0x129   : > { %991 = vrot.lane.b32.xlu2 %v2787_v9, %s3048_s4  ;;  %1273 = vst.msk [vmem:[#allocation2 + $0x41] sm:$0xff] %vm797_vm0, %v1264_v10  ;;  %1314 = vrot.lane.b32.xlu0 %v1442_v12, %s3042_s22  ;;  %v3554_v23 = vadd.f32 %v2789_v19, %v945_v22  ;;  %v1590_v41 = vld [vmem:[#allocation2 + $0x31] sm:$0xff]  ;;  %2792 = vpow2.f32 %v971_v46  ;;  %v867_v9 = vld [vmem:[%s3346_s29 + $0x20] sm:$0xff] }
 0x12a   : > { %1459 = vrot.lane.b32.xlu1 %v1442_v12, %s3047_s21  ;;  %1289 = vst.msk [vmem:[#allocation3 + $0x18] sm:$0xff] %vm797_vm0, %v1541_v13  ;;  %v848_v26 = vpop.f32.mrf.mxu0  ;;  %v1639_v48 = vld [vmem:[#allocation2 + $0x32] sm:$0xff]  ;;  %2794 = vpow2.f32 %v925_v55  ;;  %v1311_v11 = vpop.permute.xlu1 %1310 }
 0x12b   : > { %v3562_v29 = vadd.f32 %v3490_v31, %v848_v26  ;;  %1335 = vst.msk [vmem:[#allocation3] sm:$0xff] %vm1334_vm3, %v1311_v11  ;;  %2796 = vpow2.f32 %v927_v1  ;;  %v929_v26 = vmul.f32 1.442695, %v3475_v27 }
 0x12c   : > { %v1212_v33 = vpop.f32.mrf.mxu1 }
 0x12d   : > { %1141 = vst.msk [vmem:[%s3497_s20 + $0x18] sm:$0xff] %vm1137_vm2, %v3562_v29  ;;  %v1213_v36 = vadd.f32 %v3485_v30, %v1212_v33  ;;  %v938_v6 = vsub.f32 %v866_v3, %v3562_v29  ;;  %v962_v17 = vsub.f32 0.0, %v3562_v29 }
 0x12f   : > { %v1265_v39 = vadd.f32 %v1249_v34, %v1213_v36  ;;  %v2793_v56 = vpop.eup %2792  ;;  %v946_v8 = vmul.f32 %v938_v6, %v938_v6  ;;  %v1360_v16 = vpop.permute.xlu0 %1359  ;;  %v1251_v34 = vld [vmem:[%s3356_s18 + $0x30] sm:$0xff] }
 0x130   : > { %v3559_v28 = vld [vmem:[#allocation2 + $0x40] sm:$0xff]  ;;  %v2795_v7 = vpop.eup %2794  ;;  %1384 = vst.msk [vmem:[#allocation3] sm:$0xff] %vm1383_vm4, %v1360_v16  ;;  %v1701_v6 = vld [vmem:[%s4353_s15 + $0x30] sm:$0xff] }
 0x131   : > { %1508 = vrot.lane.b32.xlu2 %v1491_v25, %s3045_s1  ;;  %993 = vrot.lane.b32.xlu0 %v2791_v24, %s3048_s4  ;;  %1290 = vst.msk [vmem:[#allocation3 + $0x20] sm:$0xff] %vm797_vm0, %v3559_v28  ;;  %v1591_v57 = vld [vmem:[#allocation2 + $0x41] sm:$0xff] }
 0x132   : > { %1605 = vrot.lane.b32.xlu1 %v1442_v12, %s3049_s7  ;;  %v851_v35 = vpop.f32.mrf.mxu0  ;;  %1274 = vst.msk [vmem:[#allocation2 + $0x51] sm:$0xff] %vm797_vm0, %v1265_v39  ;;  %v2797_v12 = vpop.eup %2796  ;;  %v1640_v18 = vld [vmem:[#allocation2 + $0x42] sm:$0xff] }
 0x133   : > { %v3577_v38 = vadd.f32 %v3490_v31, %v851_v35 }
 0x134   : > { %v1215_v59 = vpop.f32.mrf.mxu1 }
 0x135   : > { %1142 = vst.msk [vmem:[%s3497_s20 + $0x20] sm:$0xff] %vm1137_vm2, %v3577_v38  ;;  %v1216_v63 = vadd.f32 %v3485_v30, %v1215_v59  ;;  %v939_v10 = vsub.f32 %v867_v9, %v3577_v38  ;;  %v963_v27 = vsub.f32 0.0, %v3577_v38 }
 0x137   : > { %v1266_v5 = vadd.f32 %v1250_v60, %v1216_v63  ;;  %v947_v19 = vmul.f32 %v939_v10, %v939_v10  ;;  %v975_v55 = vmul.f32 1.442695, %v963_v27 }
 0x139   : > { %1363 = vrot.lane.b32.xlu2 %v1491_v25, %s3044_s16  ;;  %1558 = vrot.lane.b32.xlu0 %v1541_v13, %s3051_s30  ;;  %v3599_v50 = vld [vmem:[#allocation2 + $0x50] sm:$0xff]  ;;  %1275 = vst.msk [vmem:[#allocation2 + $0x61] sm:$0xff] %vm797_vm0, %v1266_v5  ;;  %v3655_v24 = vadd.f32 %v2797_v12, %v947_v19  ;;  %v1699_v19 = vld [vmem:[%s4353_s15 + $0x20] sm:$0xff] }
 0x13a   : > { %1654 = vrot.lane.b32.xlu1 %v1491_v25, %s3050_s27  ;;  %v854_v44 = vpop.f32.mrf.mxu0  ;;  %1291 = vst.msk [vmem:[#allocation3 + $0x28] sm:$0xff] %vm797_vm0, %v3599_v50  ;;  %v973_v25 = vmul.f32 1.442695, %v962_v17  ;;  %v1592_v39 = vld [vmem:[#allocation2 + $0x51] sm:$0xff] }
 0x13b   : > { %v3592_v47 = vadd.f32 %v3490_v31, %v854_v44  ;;  %v1494_v59 = vld [vmem:[#allocation2 + $0x52] sm:$0xff] }
 0x13c   : > { %2798 = vpow2.f32 %v973_v25  ;;  %v1218_v33 = vpop.f32.mrf.mxu1  ;;  %v1698_v25 = vld [vmem:[%s4353_s15 + $0x18] sm:$0xff] }
 0x13d   : > { %1143 = vst.msk [vmem:[%s3497_s20 + $0x28] sm:$0xff] %vm1137_vm2, %v3592_v47  ;;  %2800 = vpow2.f32 %v929_v26  ;;  %v1219_v36 = vadd.f32 %v3485_v30, %v1218_v33  ;;  %v940_v44 = vsub.f32 %v868_v42, %v3592_v47  ;;  %v964_v9 = vsub.f32 0.0, %v3592_v47  ;;  %v1697_v26 = vld [vmem:[%s4353_s15 + $0x10] sm:$0xff]  ;;  %v1696_v33 = vld [vmem:[%s4353_s15 + $0x8] sm:$0xff] }
 0x13e   : > { %2802 = vpow2.f32 %v975_v55 }
 0x140   : > { %v3652_v22 = vld [vmem:[#allocation2 + $0x60] sm:$0xff] }
 0x141   : > { %1556 = vrot.lane.b32.xlu2 %v1393_v0, %s3051_s30  ;;  %1461 = vrot.lane.b32.xlu0 %v1590_v41, %s3047_s21  ;;  %1292 = vst.msk [vmem:[#allocation3 + $0x30] sm:$0xff] %vm797_vm0, %v3652_v22  ;;  %v3684_v11 = vld [vmem:[#allocation2 + $0x62] sm:$0xff] }
 0x142   : > { %1607 = vrot.lane.b32.xlu1 %v1590_v41, %s3049_s7  ;;  %v857_v53 = vpop.f32.mrf.mxu0  ;;  %v2799_v35 = vpop.eup %2798  ;;  %v1593_v10 = vld [vmem:[#allocation2 + $0x61] sm:$0xff] }
 0x143   : > { %v3609_v54 = vadd.f32 %v3490_v31, %v857_v53  ;;  %v2801_v46 = vpop.eup %2800  ;;  %v948_v53 = vmul.f32 %v940_v44, %v940_v44 }
 0x144   : > { %v2803_v63 = vpop.eup %2802 }
 0x145   : > { %1144 = vst.msk [vmem:[%s3497_s20 + $0x30] sm:$0xff] %vm1137_vm2, %v3609_v54  ;;  %v965_v55 = vsub.f32 0.0, %v3609_v54 }
 0x149   : > { %1656 = vrot.lane.b32.xlu2 %v1639_v48, %s3050_s27  ;;  %1316 = vrot.lane.b32.xlu0 %v1590_v41, %s3042_s22  ;;  %v1267_v41 = vadd.f32 %v1251_v34, %v1219_v36 }
 0x14a   : > { %1412 = vrot.lane.b32.xlu1 %v1541_v13, %s3046_s19  ;;  %v860_v0 = vpop.f32.mrf.mxu0  ;;  %v3647_v13 = vpop.permute.xlu2 %895 }
 0x14b   : > { %v3629_v2 = vadd.f32 %v3490_v31, %v860_v0  ;;  %v3642_v31 = vadd.f32 %v2795_v7, %v946_v8  ;;  %1276 = vst.msk [vmem:[#allocation2 + $0x71] sm:$0xff] %vm797_vm0, %v1267_v41  ;;  %v1702_v0 = vld [vmem:[%s4353_s15 + $0x38] sm:$0xff]  ;;  %v1221_v7 = vpop.f32.mrf.mxu1 }
 0x14c   : > { %v1252_v8 = vld [vmem:[%s3356_s18 + $0x38] sm:$0xff]  ;;  %v1222_v16 = vadd.f32 %v3485_v30, %v1221_v7  ;;  %s2325_s18 = scalar_lea.sflag [#allocation6], %s3331_s11 }
 0x14d   : > { %1145 = vst.msk [vmem:[%s3497_s20 + $0x38] sm:$0xff] %vm1137_vm2, %v3629_v2 }
 0x151   : > { %1510 = vrot.lane.b32.xlu2 %v1639_v48, %s3045_s1  ;;  %1609 = vrot.lane.b32.xlu0 %v1591_v57, %s3049_s7 }
 0x152   : > { %995 = vrot.lane.b32.xlu1 %v2793_v56, %s3048_s4  ;;  %v1703_v56 = vld [vmem:[%s4353_s15 + $0x40] sm:$0xff]  ;;  %v3689_v1 = vld [vmem:[#allocation2 + $0x70] sm:$0xff] }
 0x153   : > { %1740 = vmatpush.msrb.mxu0 %v1703_v56  ;;  %2679 = vmatpush.msra.mxu2 %v1703_v56  ;;  %1293 = vst.msk [vmem:[#allocation3 + $0x38] sm:$0xff] %vm797_vm0, %v3689_v1  ;;  %v1643_v41 = vld [vmem:[#allocation2 + $0x72] sm:$0xff] }
 0x154   : > { %v1447_v56 = vld [vmem:[#allocation2 + $0x71] sm:$0xff] }
 0x155   : > { %1741 = vmatpush.msrb.mxu0 %v1702_v0  ;;  %2680 = vmatpush.msra.mxu2 %v1702_v0 }
 0x157   : > { %1742 = vmatpush.msrb.mxu0 %v1701_v6  ;;  %2681 = vmatpush.msra.mxu2 %v1701_v6 }
 0x159   : > { %1365 = vrot.lane.b32.xlu2 %v1639_v48, %s3044_s16  ;;  %1414 = vrot.lane.b32.xlu0 %v3559_v28, %s3046_s19 }
 0x15a   : > { %1560 = vrot.lane.b32.xlu1 %v3559_v28, %s3051_s30  ;;  %v3662_v28 = vpop.permute.xlu2 %897 }
 0x161   : > { %1658 = vrot.lane.b32.xlu2 %v1640_v18, %s3050_s27  ;;  %1318 = vrot.lane.b32.xlu0 %v1591_v57, %s3042_s22 }
 0x162   : > { %1463 = vrot.lane.b32.xlu1 %v1591_v57, %s3047_s21  ;;  %v3678_v57 = vadd.f32 %v2801_v46, %v948_v53 }
 0x169   : > { %1512 = vrot.lane.b32.xlu2 %v1640_v18, %s3045_s1  ;;  %1562 = vrot.lane.b32.xlu0 %v3599_v50, %s3051_s30 }
 0x16a   : > { %1367 = vrot.lane.b32.xlu1 %v1640_v18, %s3044_s16  ;;  %v977_v18 = vmul.f32 1.442695, %v964_v9 }
 0x16c   : > { %2804 = vpow2.f32 %v977_v18 }
 0x171   : > { %997 = vrot.lane.b32.xlu2 %v2799_v35, %s3048_s4  ;;  %1465 = vrot.lane.b32.xlu0 %v1592_v39, %s3047_s21 }
 0x172   : > { %1611 = vrot.lane.b32.xlu1 %v1592_v39, %s3049_s7 }
 0x173   : > { %v1362_v48 = vpop.permute.xlu2 %1361 }
 0x179   : > { %1660 = vrot.lane.b32.xlu2 %v1494_v59, %s3050_s27  ;;  %1369 = vrot.lane.b32.xlu0 %v1494_v59, %s3044_s16 }
 0x17a   : > { %1514 = vrot.lane.b32.xlu1 %v1494_v59, %s3045_s1 }
 0x17b   : > { %v1409_v60 = vpop.permute.xlu2 %1408 }
 0x17c   : > { %1433 = vst.msk [vmem:[#allocation3] sm:$0xff] %vm1432_vm5, %v1409_v60 }
 0x181   : > { %1416 = vrot.lane.b32.xlu2 %v3599_v50, %s3046_s19  ;;  %999 = vrot.lane.b32.xlu0 %v2803_v63, %s3048_s4  ;;  %v1700_v50 = vld [vmem:[%s4353_s15 + $0x28] sm:$0xff] }
 0x182   : > { %1662 = vrot.lane.b32.xlu1 %v3684_v11, %s3050_s27  ;;  %1743 = vmatpush.msrb.mxu0 %v1700_v50 }
 0x183   : > { %v992_v3 = vpop.permute.xlu2 %991  ;;  %2682 = vmatpush.msra.mxu2 %v1700_v50 }
 0x184   : > { %v3699_v5 = vmul.f32 %v992_v3, %v3511_v45  ;;  %v1268_v45 = vadd.f32 %v1252_v8, %v1222_v16  ;;  %1744 = vmatpush.msrb.mxu0 %v1699_v19 }
 0x185   : > { %2683 = vmatpush.msra.mxu2 %v1699_v19 }
 0x186   : > { %1277 = vst.msk [vmem:[#allocation2 + $0x81] sm:$0xff] %vm797_vm0, %v1268_v45  ;;  %1745 = vmatpush.msrb.mxu0 %v1698_v25 }
 0x187   : > { %2684 = vmatpush.msra.mxu2 %v1698_v25 }
 0x188   : > { %1746 = vmatpush.msrb.mxu0 %v1697_v26 }
 0x189   : > { %1320 = vrot.lane.b32.xlu2 %v1592_v39, %s3042_s22  ;;  %1613 = vrot.lane.b32.xlu0 %v1593_v10, %s3049_s7  ;;  %v2805_v39 = vpop.eup %2804 }
 0x18a   : > { %1418 = vrot.lane.b32.xlu1 %v3652_v22, %s3046_s19  ;;  %2685 = vmatpush.msra.mxu2 %v1697_v26  ;;  %v1645_v26 = vld [vmem:[#allocation2 + $0x92] sm:$0xff] }
 0x18b   : > { %v1509_v17 = vpop.permute.xlu2 %1508  ;;  %v1507_v30 = vpop.permute.xlu0 %1506  ;;  %1747 = vmatpush.msrb.mxu0 %v1696_v33 }
 0x18c   : > { %v1313_v12 = vpop.permute.xlu1 %1312  ;;  %2686 = vmatpush.msra.mxu2 %v1696_v33  ;;  %v1596_v33 = vld [vmem:[#allocation2 + $0x91] sm:$0xff] }
 0x18d   : > { %1336 = vst.msk [vmem:[#allocation3 + $0x8] sm:$0xff] %vm1334_vm3, %v1313_v12  ;;  %v1546_v0 = vld [vmem:[#allocation2 + $0x80] sm:$0xff] }
 0x18e   : > { %1385 = vst.msk [vmem:[#allocation3 + $0x8] sm:$0xff] %vm1383_vm4, %v1362_v48  ;;  %v1595_v9 = vld [vmem:[#allocation2 + $0x81] sm:$0xff] }
 0x18f   : > { %v1497_v18 = vld [vmem:[#allocation2 + $0x82] sm:$0xff] }
 0x191   : > { %1564 = vrot.lane.b32.xlu2 %v3652_v22, %s3051_s30  ;;  %1516 = vrot.lane.b32.xlu0 %v3684_v11, %s3045_s1  ;;  %v1695_v22 = vld [vmem:[%s4353_s15] sm:$0xff] }
 0x192   : > { %1322 = vrot.lane.b32.xlu1 %v1593_v10, %s3042_s22  ;;  %1748 = vmatpush.msrb.mxu0 %v1695_v22 }
 0x193   : > { %v1364_v35 = vpop.permute.xlu2 %1363  ;;  %v1411_v36 = vpop.permute.xlu0 %1410  ;;  %2687 = vmatpush.msra.mxu2 %v1695_v22  ;;  %v2061_v22 = vld [vmem:[#allocation2 + $0x90] sm:$0xff] }
 0x194   : > { %v1458_v34 = vpop.permute.xlu1 %1457  ;;  %1434 = vst.msk [vmem:[#allocation3 + $0x8] sm:$0xff] %vm1432_vm5, %v1411_v36 }
 0x195   : > { %1482 = vst.msk [vmem:[#allocation3] sm:$0xff] %vm1481_vm6, %v1458_v34 }
 0x196   : > { %1531 = vst.msk [vmem:[#allocation3] sm:$0xff] %vm1530_vm7, %v1507_v30 }
 0x199   : > { %1467 = vrot.lane.b32.xlu2 %v1593_v10, %s3047_s21  ;;  %1664 = vrot.lane.b32.xlu0 %v1643_v41, %s3050_s27 }
 0x19a   : > { %1001 = vrot.lane.b32.xlu1 %v2805_v39, %s3048_s4 }
 0x19b   : > { %v1557_v27 = vpop.permute.xlu2 %1556  ;;  %v1315_v44 = vpop.permute.xlu0 %1314 }
 0x19c   : > { %v1460_v42 = vpop.permute.xlu1 %1459  ;;  %1337 = vst.msk [vmem:[#allocation3 + $0x10] sm:$0xff] %vm1334_vm3, %v1315_v44 }
 0x19d   : > { %1483 = vst.msk [vmem:[#allocation3 + $0x8] sm:$0xff] %vm1481_vm6, %v1460_v42 }
 0x19e   : > { %1386 = vst.msk [vmem:[#allocation3 + $0x10] sm:$0xff] %vm1383_vm4, %v1364_v35 }
 0x19f   : > { %1581 = vst.msk [vmem:[#allocation3] sm:$0xff] %vm1580_vm8, %v1557_v27 }
 0x1a0   : > { %1532 = vst.msk [vmem:[#allocation3 + $0x8] sm:$0xff] %vm1530_vm7, %v1509_v17 }
 0x1a1   : > { %1371 = vrot.lane.b32.xlu2 %v3684_v11, %s3044_s16  ;;  %1420 = vrot.lane.b32.xlu0 %v3689_v1, %s3046_s19  ;;  %v979_v11 = vmul.f32 1.442695, %v965_v55 }
 0x1a2   : > { %1566 = vrot.lane.b32.xlu1 %v3689_v1, %s3051_s30  ;;  %v966_v1 = vsub.f32 0.0, %v3629_v2 }
 0x1a3   : > { %v1657_v48 = vpop.permute.xlu2 %1656  ;;  %v3755_v53 = vpop.permute.xlu0 %993  ;;  %2806 = vpow2.f32 %v979_v11 }
 0x1a4   : > { %v1606_v46 = vpop.permute.xlu1 %1605  ;;  %v981_v50 = vmul.f32 1.442695, %v966_v1 }
 0x1a5   : > { %1630 = vst.msk [vmem:[#allocation3] sm:$0xff] %vm1629_vm9, %v1606_v46 }
 0x1a6   : > { %2808 = vpow2.f32 %v981_v50 }
 0x1a9   : > { %1615 = vrot.lane.b32.xlu2 %v1447_v56, %s3049_s7  ;;  %1324 = vrot.lane.b32.xlu0 %v1447_v56, %s3042_s22  ;;  %v2807_v16 = vpop.eup %2806 }
 0x1aa   : > { %1469 = vrot.lane.b32.xlu1 %v1447_v56, %s3047_s21 }
 0x1ab   : > { %v1511_v60 = vpop.permute.xlu2 %1510  ;;  %v1559_v63 = vpop.permute.xlu0 %1558 }
 0x1ac   : > { %v1655_v59 = vpop.permute.xlu1 %1654  ;;  %1582 = vst.msk [vmem:[#allocation3 + $0x8] sm:$0xff] %vm1580_vm8, %v1559_v63 }
 0x1ad   : > { %1679 = vst.msk [vmem:[#allocation3] sm:$0xff] %vm1678_vm10, %v1655_v59 }
 0x1b1   : > { %1518 = vrot.lane.b32.xlu2 %v1643_v41, %s3045_s1  ;;  %1568 = vrot.lane.b32.xlu0 %v1546_v0, %s3051_s30 }
 0x1b2   : > { %1373 = vrot.lane.b32.xlu1 %v1643_v41, %s3044_s16 }
 0x1b3   : > { %v1366_v6 = vpop.permute.xlu2 %1365  ;;  %v1462_v8 = vpop.permute.xlu0 %1461 }
 0x1b4   : > { %v1608_v3 = vpop.permute.xlu1 %1607  ;;  %v1687_v7 = vld [vmem:[#allocation3] sm:$0xff] }
 0x1b5   : > { %1631 = vst.msk [vmem:[#allocation3 + $0x8] sm:$0xff] %vm1629_vm9, %v1608_v3  ;;  %2649 = vmatmul.msk.f32.vlgmr.msrb.gmra.mxu0 %vm1708_vm11, %v1687_v7 }
 0x1b6   : > { %1680 = vst.msk [vmem:[#allocation3 + $0x8] sm:$0xff] %vm1678_vm10, %v1657_v48  ;;  %v1016_v48 = vmul.f32 %v3755_v53, %v3529_v61 }
 0x1b7   : > { %1806 = vst.msk [vmem:[#allocation3] sm:$0xff] %vm797_vm0, %v3621_v62  ;;  %v2809_v62 = vpop.eup %2808 }
 0x1b9   : > { %1003 = vrot.lane.b32.xlu2 %v2807_v16, %s3048_s4  ;;  %1471 = vrot.lane.b32.xlu0 %v1595_v9, %s3047_s21 }
 0x1ba   : > { %1617 = vrot.lane.b32.xlu1 %v1595_v9, %s3049_s7  ;;  %v869_v9 = vld [vmem:[%s3346_s29 + $0x30] sm:$0xff] }
 0x1bb   : > { %v1659_v10 = vpop.permute.xlu2 %1658  ;;  %v1317_v12 = vpop.permute.xlu0 %1316 }
 0x1bc   : > { %v1413_v45 = vpop.permute.xlu1 %1412  ;;  %1338 = vst.msk [vmem:[#allocation3 + $0x18] sm:$0xff] %vm1334_vm3, %v1317_v12 }
 0x1bd   : > { %1435 = vst.msk [vmem:[#allocation3 + $0x10] sm:$0xff] %vm1432_vm5, %v1413_v45  ;;  %v1688_v17 = vld [vmem:[#allocation3 + $0x8] sm:$0xff]  ;;  %v941_v45 = vsub.f32 %v869_v9, %v3609_v54  ;;  %v914_v9 = vsub.f32 %v3562_v29, %v3589_v43 }
 0x1be   : > { %1484 = vst.msk [vmem:[#allocation3 + $0x10] sm:$0xff] %vm1481_vm6, %v1462_v8  ;;  %2650 = vmatmul.msk.f32.vlgmr.msra.gmra.mxu2 %vm1708_vm11, %v1688_v17 }
 0x1bf   : > { %1533 = vst.msk [vmem:[#allocation3 + $0x10] sm:$0xff] %vm1530_vm7, %v1511_v60 }
 0x1c0   : > { %1387 = vst.msk [vmem:[#allocation3 + $0x18] sm:$0xff] %vm1383_vm4, %v1366_v6 }
 0x1c1   : > { %1666 = vrot.lane.b32.xlu2 %v1497_v18, %s3050_s27  ;;  %1005 = vrot.lane.b32.xlu0 %v2809_v62, %s3048_s4 }
 0x1c2   : > { %1520 = vrot.lane.b32.xlu1 %v1497_v18, %s3045_s1  ;;  %v949_v18 = vmul.f32 %v941_v45, %v941_v45 }
 0x1c3   : > { %v1513_v19 = vpop.permute.xlu2 %1512  ;;  %v1610_v25 = vpop.permute.xlu0 %1609 }
 0x1c4   : > { %v996_v30 = vpop.permute.xlu1 %995 }
 0x1c5   : > { %v1017_v55 = vmul.f32 %v996_v30, %v3554_v23 }
 0x1c9   : > { %1422 = vrot.lane.b32.xlu2 %v1546_v0, %s3046_s19  ;;  %1619 = vrot.lane.b32.xlu0 %v1596_v33, %s3049_s7 }
 0x1ca   : > { %1668 = vrot.lane.b32.xlu1 %v1645_v26, %s3050_s27 }
 0x1cb   : > { %v998_v35 = vpop.permute.xlu2 %997  ;;  %v1415_v36 = vpop.permute.xlu0 %1414 }
 0x1cc   : > { %v1561_v34 = vpop.permute.xlu1 %1560  ;;  %1436 = vst.msk [vmem:[#allocation3 + $0x18] sm:$0xff] %vm1432_vm5, %v1415_v36  ;;  %v1018_v61 = vmul.f32 %v998_v35, %v3642_v31 }
 0x1cd   : > { %1583 = vst.msk [vmem:[#allocation3 + $0x10] sm:$0xff] %vm1580_vm8, %v1561_v34 }
 0x1ce   : > { %1632 = vst.msk [vmem:[#allocation3 + $0x10] sm:$0xff] %vm1629_vm9, %v1610_v25 }
 0x1cf   : > { %1681 = vst.msk [vmem:[#allocation3 + $0x10] sm:$0xff] %vm1678_vm10, %v1659_v10 }
 0x1d1   : > { %1570 = vrot.lane.b32.xlu2 %v2061_v22, %s3051_s30  ;;  %2084 = vrot.lane.b32.xlu0 %v2061_v22, %s3051_s30 }
 0x1d2   : > { %1830 = vrot.lane.b32.xlu1 %v3444_v20, %s3042_s22 }
 0x1d3   : > { %v1661_v41 = vpop.permute.xlu2 %1660  ;;  %v1319_v42 = vpop.permute.xlu0 %1318 }
 0x1d4   : > { %v1464_v39 = vpop.permute.xlu1 %1463  ;;  %1339 = vst.msk [vmem:[#allocation3 + $0x20] sm:$0xff] %vm1334_vm3, %v1319_v42  ;;  %v933_v42 = vmul.f32 1.442695, %v3418_v14  ;;  %v3859_v14 = vld [vmem:[%s4354_s9] ss:$0 sm:$0xff] }
 0x1d5   : > { %1485 = vst.msk [vmem:[#allocation3 + $0x18] sm:$0xff] %vm1481_vm6, %v1464_v39 }
 0x1d6   : > { %1534 = vst.msk [vmem:[#allocation3 + $0x18] sm:$0xff] %vm1530_vm7, %v1513_v19  ;;  %v1689_v27 = vld [vmem:[#allocation3 + $0x10] sm:$0xff] }
 0x1d7   : > { %2651 = vmatmul.msk.f32.gmra.mxu2 %vm1708_vm11, %v1689_v27  ;;  %v870_v27 = vld [vmem:[%s3346_s29 + $0x38] sm:$0xff]  ;;  %s3863_s29 = scalar_lea.vmem [#allocation12], %s3334_s23  ;;  %s2348_s23 = sshll.u32 %s3875_s24, 4  ;;  %s2349_s23 = int_to_ptr.vmem [resolvable:$true] %s2348_s23 }
 0x1d8   : > { %v1254_v45 = vld [vmem:[%s3863_s29 + $0x8] sm:$0xff] }
 0x1d9   : > { %2132 = vrot.lane.b32.xlu2 %v1596_v33, %s3049_s7  ;;  %1878 = vrot.lane.b32.xlu0 %v3447_v21, %s3044_s16 }
 0x1da   : > { %2180 = vrot.lane.b32.xlu1 %v1645_v26, %s3050_s27 }
 0x1db   : > { %v1417_v44 = vpop.permute.xlu2 %1416  ;;  %v1563_v46 = vpop.permute.xlu0 %1562 }
 0x1dc   : > { %v1368_v20 = vpop.permute.xlu1 %1367  ;;  %1584 = vst.msk [vmem:[#allocation3 + $0x18] sm:$0xff] %vm1580_vm8, %v1563_v46  ;;  %v942_v46 = vsub.f32 %v870_v27, %v3629_v2 }
 0x1dd   : > { %1388 = vst.msk [vmem:[#allocation3 + $0x20] sm:$0xff] %vm1383_vm4, %v1368_v20 }
 0x1de   : > { %1437 = vst.msk [vmem:[#allocation3 + $0x20] sm:$0xff] %vm1432_vm5, %v1417_v44 }
 0x1e1   : > { %1033 = vrot.lane.b32.xlu2 %v1016_v48, %s3042_s22  ;;  %1035 = vrot.lane.b32.xlu0 %v1017_v55, %s3042_s22  ;;  %v950_v55 = vmul.f32 %v942_v46, %v942_v46 }
 0x1e2   : > { %1031 = vrot.lane.b32.xlu1 %v3699_v5, %s3042_s22 }
 0x1e3   : > { %v1321_v56 = vpop.permute.xlu2 %1320  ;;  %v1466_v59 = vpop.permute.xlu0 %1465 }
 0x1e4   : > { %v1612_v21 = vpop.permute.xlu1 %1611  ;;  %1486 = vst.msk [vmem:[#allocation3 + $0x20] sm:$0xff] %vm1481_vm6, %v1466_v59 }
 0x1e5   : > { %1633 = vst.msk [vmem:[#allocation3 + $0x18] sm:$0xff] %vm1629_vm9, %v1612_v21 }
 0x1e6   : > { %1682 = vst.msk [vmem:[#allocation3 + $0x18] sm:$0xff] %vm1678_vm10, %v1661_v41 }
 0x1e7   : > { %1340 = vst.msk [vmem:[#allocation3 + $0x28] sm:$0xff] %vm1334_vm3, %v1321_v56 }
 0x1e9   : > { %1037 = vrot.lane.b32.xlu2 %v1018_v61, %s3042_s22  ;;  %v1253_v61 = vld [vmem:[%s3863_s29] sm:$0xff] }
 0x1eb   : > { %v1565_v53 = vpop.permute.xlu2 %1564  ;;  %v1370_v5 = vpop.permute.xlu0 %1369 }
 0x1ec   : > { %v1515_v23 = vpop.permute.xlu1 %1514  ;;  %1389 = vst.msk [vmem:[#allocation3 + $0x28] sm:$0xff] %vm1383_vm4, %v1370_v5 }
 0x1ed   : > { %1535 = vst.msk [vmem:[#allocation3 + $0x20] sm:$0xff] %vm1530_vm7, %v1515_v23  ;;  %v1690_v60 = vld [vmem:[#allocation3 + $0x18] sm:$0xff] }
 0x1ee   : > { %2652 = vmatmul.msk.f32.gmra.mxu2 %vm1708_vm11, %v1690_v60  ;;  %1585 = vst.msk [vmem:[#allocation3 + $0x20] sm:$0xff] %vm1580_vm8, %v1565_v53 }
 0x1f3   : > { %v1468_v63 = vpop.permute.xlu2 %1467  ;;  %v1000_v0 = vpop.permute.xlu0 %999 }
 0x1f4   : > { %v1663_v11 = vpop.permute.xlu1 %1662  ;;  %v1019_v31 = vmul.f32 %v1000_v0, %v3655_v24  ;;  %v931_v24 = vmul.f32 1.442695, %v3421_v15 }
 0x1f6   : > { %1039 = vrot.lane.b32.xlu0 %v1019_v31, %s3042_s22  ;;  %2810 = vpow2.f32 %v931_v24 }
 0x1f7   : > { %2812 = vpow2.f32 %v933_v42 }
 0x1fb   : > { %v1372_v3 = vpop.permute.xlu2 %1371  ;;  %v1614_v6 = vpop.permute.xlu0 %1613 }
 0x1fc   : > { %v1419_v1 = vpop.permute.xlu1 %1418  ;;  %1634 = vst.msk [vmem:[#allocation3 + $0x20] sm:$0xff] %vm1629_vm9, %v1614_v6  ;;  %v2811_v15 = vpop.eup %2810 }
 0x1fd   : > { %1438 = vst.msk [vmem:[#allocation3 + $0x28] sm:$0xff] %vm1432_vm5, %v1419_v1  ;;  %v957_v30 = vadd.f32 %v2811_v15, %v949_v18  ;;  %v2813_v21 = vpop.eup %2812  ;;  %v912_v1 = vsub.f32 %v3516_v49, %v3601_v51 }
 0x1fe   : > { %1487 = vst.msk [vmem:[#allocation3 + $0x28] sm:$0xff] %vm1481_vm6, %v1468_v63  ;;  %v958_v53 = vadd.f32 %v2813_v21, %v950_v55 }
 0x1ff   : > { %1683 = vst.msk [vmem:[#allocation3 + $0x20] sm:$0xff] %vm1678_vm10, %v1663_v11 }
 0x203   : > { %v1616_v8 = vpop.permute.xlu2 %1615  ;;  %v1517_v50 = vpop.permute.xlu0 %1516 }
 0x204   : > { %v1323_v7 = vpop.permute.xlu1 %1322  ;;  %1536 = vst.msk [vmem:[#allocation3 + $0x28] sm:$0xff] %vm1530_vm7, %v1517_v50 }
 0x205   : > { %1341 = vst.msk [vmem:[#allocation3 + $0x30] sm:$0xff] %vm1334_vm3, %v1323_v7 }
 0x206   : > { %1390 = vst.msk [vmem:[#allocation3 + $0x30] sm:$0xff] %vm1383_vm4, %v1372_v3  ;;  %v1691_v16 = vld [vmem:[#allocation3 + $0x20] sm:$0xff] }
 0x207   : > { %2653 = vmatmul.msk.f32.gmra.mxu2 %vm1708_vm11, %v1691_v16 }
 0x20b   : > { %v1519_v12 = vpop.permute.xlu2 %1518  ;;  %v1665_v62 = vpop.permute.xlu0 %1664 }
 0x20c   : > { %v1002_v10 = vpop.permute.xlu1 %1001 }
 0x20d   : > { %v1020_v17 = vmul.f32 %v1002_v10, %v3678_v57 }
 0x20f   : > { %1041 = vrot.lane.b32.xlu1 %v1020_v17, %s3042_s22 }
 0x213   : > { %v1004_v25 = vpop.permute.xlu2 %1003  ;;  %v1421_v26 = vpop.permute.xlu0 %1420 }
 0x214   : > { %v1567_v19 = vpop.permute.xlu1 %1566  ;;  %v1021_v33 = vmul.f32 %v1004_v25, %v957_v30  ;;  %1439 = vst.msk [vmem:[#allocation3 + $0x30] sm:$0xff] %vm1432_vm5, %v1421_v26  ;;  %v913_v26 = vsub.f32 %v3540_v4, %v3571_v32 }
 0x215   : > { %1586 = vst.msk [vmem:[#allocation3 + $0x28] sm:$0xff] %vm1580_vm8, %v1567_v19 }
 0x216   : > { %1635 = vst.msk [vmem:[#allocation3 + $0x28] sm:$0xff] %vm1629_vm9, %v1616_v8  ;;  %1043 = vrot.lane.b32.xlu2 %v1021_v33, %s3042_s22 }
 0x217   : > { %1684 = vst.msk [vmem:[#allocation3 + $0x28] sm:$0xff] %vm1678_vm10, %v1665_v62 }
 0x21b   : > { %v1667_v34 = vpop.permute.xlu2 %1666  ;;  %v1325_v35 = vpop.permute.xlu0 %1324 }
 0x21c   : > { %v1470_v57 = vpop.permute.xlu1 %1469  ;;  %1342 = vst.msk [vmem:[#allocation3 + $0x38] sm:$0xff] %vm1334_vm3, %v1325_v35 }
 0x21d   : > { %1488 = vst.msk [vmem:[#allocation3 + $0x30] sm:$0xff] %vm1481_vm6, %v1470_v57 }
 0x21e   : > { %1537 = vst.msk [vmem:[#allocation3 + $0x30] sm:$0xff] %vm1530_vm7, %v1519_v12  ;;  %v1692_v36 = vld [vmem:[#allocation3 + $0x28] sm:$0xff] }
 0x21f   : > { %2654 = vmatmul.msk.f32.gmra.mxu2 %vm1708_vm11, %v1692_v36  ;;  %v1255_v36 = vld [vmem:[%s3863_s29 + $0x10] sm:$0xff] }
 0x223   : > { %v1423_v39 = vpop.permute.xlu2 %1422  ;;  %v1569_v41 = vpop.permute.xlu0 %1568 }
 0x224   : > { %v1374_v22 = vpop.permute.xlu1 %1373  ;;  %1587 = vst.msk [vmem:[#allocation3 + $0x30] sm:$0xff] %vm1580_vm8, %v1569_v41 }
 0x225   : > { %1391 = vst.msk [vmem:[#allocation3 + $0x38] sm:$0xff] %vm1383_vm4, %v1374_v22 }
 0x226   : > { %1440 = vst.msk [vmem:[#allocation3 + $0x38] sm:$0xff] %vm1432_vm5, %v1423_v39 }
 0x22b   : > { %v1571_v44 = vpop.permute.xlu2 %1570  ;;  %v1472_v48 = vpop.permute.xlu0 %1471 }
 0x22c   : > { %v1618_v20 = vpop.permute.xlu1 %1617  ;;  %1489 = vst.msk [vmem:[#allocation3 + $0x38] sm:$0xff] %vm1481_vm6, %v1472_v48 }
 0x22d   : > { %1636 = vst.msk [vmem:[#allocation3 + $0x30] sm:$0xff] %vm1629_vm9, %v1618_v20 }
 0x22e   : > { %1685 = vst.msk [vmem:[#allocation3 + $0x30] sm:$0xff] %vm1678_vm10, %v1667_v34 }
 0x232   : > { %v1750_v56 = vpop.f32.mrf.mxu0 }
 0x233   : > { %v1751_v59 = vadd.f32 %v3859_v14, %v1750_v56  ;;  %v3866_v5 = vpop.permute.xlu2 %2132  ;;  %v1006_v11 = vpop.permute.xlu0 %1005 }
 0x234   : > { %v1521_v23 = vpop.permute.xlu1 %1520  ;;  %v1022_v0 = vmul.f32 %v1006_v11, %v958_v53 }
 0x235   : > { %v3868_v60 = vmax.f32 %v1751_v59, 0.0  ;;  %1538 = vst.msk [vmem:[#allocation3 + $0x38] sm:$0xff] %vm1530_vm7, %v1521_v23  ;;  %v1693_v63 = vld [vmem:[#allocation3 + $0x30] sm:$0xff] }
 0x236   : > { %1588 = vst.msk [vmem:[#allocation3 + $0x38] sm:$0xff] %vm1580_vm8, %v1571_v44  ;;  %2655 = vmatmul.msk.f32.gmra.mxu2 %vm1708_vm11, %v1693_v63  ;;  %1045 = vrot.lane.b32.xlu2 %v1022_v0, %s3042_s22  ;;  %v1256_v44 = vld [vmem:[%s3863_s29 + $0x18] sm:$0xff]  ;;  %v1257_v63 = vld [vmem:[%s3863_s29 + $0x20] sm:$0xff] }
 0x237   : > { %v1782_v31 = vadd.f32 %v3868_v60, %v1253_v61  ;;  %2300 = vst.msk [vmem:[%s3875_s24] sm:$0xff] %vm797_vm0, %v3868_v60  ;;  %v916_v61 = vsub.f32 %v3592_v47, %v3662_v28 }
 0x239   : > { %1790 = vst.msk [vmem:[#allocation2 + $0x11] sm:$0xff] %vm797_vm0, %v1782_v31 }
 0x23b   : > { %v1034_v6 = vpop.permute.xlu2 %1033  ;;  %v1620_v7 = vpop.permute.xlu0 %1619 }
 0x23c   : > { %v1669_v3 = vpop.permute.xlu1 %1668  ;;  %v3884_v8 = vadd.f32 %v1034_v6, %v912_v1  ;;  %1637 = vst.msk [vmem:[#allocation3 + $0x38] sm:$0xff] %vm1629_vm9, %v1620_v7 }
 0x23d   : > { %1686 = vst.msk [vmem:[#allocation3 + $0x38] sm:$0xff] %vm1678_vm10, %v1669_v3 }
 0x240   : > { %v3888_v50 = vld [vmem:[#allocation2 + $0x12] sm:$0xff] }
 0x241   : > { %v3890_v24 = vld [vmem:[#allocation2 + $0x11] sm:$0xff]  ;;  %1880 = vrot.lane.b32.xlu0 %v3888_v50, %s3044_s16  ;;  %v1753_v49 = vpop.f32.mrf.mxu2 }
 0x242   : > { %v1910_v16 = vld [vmem:[#allocation2 + $0x10] sm:$0xff]  ;;  %1832 = vrot.lane.b32.xlu2 %v3890_v24, %s3042_s22  ;;  %v1754_v51 = vadd.f32 %v3859_v14, %v1753_v49 }
 0x243   : > { %1807 = vst.msk [vmem:[#allocation3 + $0x8] sm:$0xff] %vm797_vm0, %v1910_v16  ;;  %v1038_v17 = vpop.permute.xlu2 %1037  ;;  %v3904_v62 = vpop.permute.xlu0 %2084 }
 0x244   : > { %v3901_v10 = vmax.f32 %v1754_v51, 0.0  ;;  %v1831_v12 = vpop.permute.xlu1 %1830  ;;  %v3906_v18 = vadd.f32 %v1038_v17, %v914_v9  ;;  %v1694_v30 = vld [vmem:[#allocation3 + $0x38] sm:$0xff] }
 0x245   : > { %1854 = vst.msk [vmem:[#allocation3] sm:$0xff] %vm1334_vm3, %v1831_v12  ;;  %2656 = vmatmul.msk.f32.gmra.mxu2 %vm1708_vm11, %v1694_v30 }
 0x246   : > { %v1783_v15 = vadd.f32 %v3901_v10, %v1254_v45  ;;  %2301 = vst.msk [vmem:[%s3875_s24 + $0x8] sm:$0xff] %vm797_vm0, %v3901_v10  ;;  %v1258_v45 = vld [vmem:[%s3863_s29 + $0x28] sm:$0xff] }
 0x248   : > { %1791 = vst.msk [vmem:[#allocation2 + $0x21] sm:$0xff] %vm797_vm0, %v1783_v15 }
 0x24a   : > { %1926 = vrot.lane.b32.xlu2 %v1910_v16, %s3046_s19 }
 0x24b   : > { %v1879_v29 = vpop.permute.xlu0 %1878 }
 0x24c   : > { %1902 = vst.msk [vmem:[#allocation3] sm:$0xff] %vm1383_vm4, %v1879_v29  ;;  %v3951_v42 = vpop.permute.xlu1 %2180 }
 0x24f   : > { %v3916_v43 = vld [vmem:[#allocation2 + $0x22] sm:$0xff] }
 0x250   : > { %v3918_v19 = vld [vmem:[#allocation2 + $0x20] sm:$0xff]  ;;  %2024 = vrot.lane.b32.xlu0 %v3916_v43, %s3045_s1 }
 0x251   : > { %v3920_v25 = vld [vmem:[#allocation2 + $0x21] sm:$0xff]  ;;  %1928 = vrot.lane.b32.xlu1 %v3918_v19, %s3046_s19  ;;  %1808 = vst.msk [vmem:[#allocation3 + $0x10] sm:$0xff] %vm797_vm0, %v3918_v19 }
 0x252   : > { %1976 = vrot.lane.b32.xlu2 %v3920_v25, %s3047_s21 }
 0x253   : > { %v1036_v33 = vpop.permute.xlu0 %1035 }
 0x254   : > { %v3932_v57 = vadd.f32 %v1036_v33, %v913_v26  ;;  %v3965_v55 = vpop.permute.xlu1 %1031  ;;  %v2214_v33 = vld [vmem:[%s4355_s10 + $0x40] sm:$0xff] }
 0x255   : > { %2688 = vmatpush.msra.mxu3 %v2214_v33  ;;  %2250 = vmatpush.msrb.mxu1 %v2214_v33 }
 0x259   : > { %1834 = vrot.lane.b32.xlu1 %v3920_v25, %s3042_s22 }
 0x25a   : > { %1882 = vrot.lane.b32.xlu2 %v3916_v43, %s3044_s16  ;;  %v1756_v34 = vpop.f32.mrf.mxu2 }
 0x25b   : > { %v1757_v35 = vadd.f32 %v3859_v14, %v1756_v34  ;;  %v2213_v34 = vld [vmem:[%s4355_s10 + $0x38] sm:$0xff] }
 0x25c   : > { %2689 = vmatpush.msra.mxu3 %v2213_v34  ;;  %2251 = vmatpush.msrb.mxu1 %v2213_v34 }
 0x25d   : > { %v3940_v22 = vmax.f32 %v1757_v35, 0.0 }
 0x25f   : > { %v1784_v39 = vadd.f32 %v3940_v22, %v1255_v36  ;;  %2302 = vst.msk [vmem:[%s3875_s24 + $0x10] sm:$0xff] %vm797_vm0, %v3940_v22 }
 0x261   : > { %1792 = vst.msk [vmem:[#allocation2 + $0x31] sm:$0xff] %vm797_vm0, %v1784_v39 }
 0x268   : > { %v2151_v4 = vld [vmem:[#allocation2 + $0x32] sm:$0xff]  ;;  %v4015_v15 = vpop.permute.xlu0 %1039 }
 0x269   : > { %v2103_v32 = vld [vmem:[#allocation2 + $0x31] sm:$0xff]  ;;  %2168 = vrot.lane.b32.xlu0 %v2151_v4, %s3050_s27 }
 0x26a   : > { %v2055_v41 = vld [vmem:[#allocation2 + $0x30] sm:$0xff]  ;;  %2120 = vrot.lane.b32.xlu2 %v2103_v32, %s3049_s7 }
 0x26b   : > { %1809 = vst.msk [vmem:[#allocation3 + $0x18] sm:$0xff] %vm797_vm0, %v2055_v41  ;;  %2072 = vrot.lane.b32.xlu1 %v2055_v41, %s3051_s30 }
 0x270   : > { %v3980_v11 = vpop.permute.xlu2 %1043 }
 0x271   : > { %1930 = vrot.lane.b32.xlu0 %v2055_v41, %s3046_s19  ;;  %v1759_v27 = vpop.f32.mrf.mxu2  ;;  %v2211_v41 = vld [vmem:[%s4355_s10 + $0x28] sm:$0xff] }
 0x272   : > { %2026 = vrot.lane.b32.xlu2 %v2151_v4, %s3045_s1  ;;  %v1760_v20 = vadd.f32 %v3859_v14, %v1759_v27  ;;  %v1259_v27 = vld [vmem:[%s3863_s29 + $0x30] sm:$0xff] }
 0x273   : > { %1978 = vrot.lane.b32.xlu1 %v2103_v32, %s3047_s21 }
 0x274   : > { %v3958_v46 = vmax.f32 %v1760_v20, 0.0 }
 0x276   : > { %v1785_v48 = vadd.f32 %v3958_v46, %v1256_v44  ;;  %2303 = vst.msk [vmem:[%s3875_s24 + $0x18] sm:$0xff] %vm797_vm0, %v3958_v46 }
 0x278   : > { %1793 = vst.msk [vmem:[#allocation2 + $0x41] sm:$0xff] %vm797_vm0, %v1785_v48  ;;  %v2210_v48 = vld [vmem:[%s4355_s10 + $0x20] sm:$0xff] }
 0x279   : > { %1836 = vrot.lane.b32.xlu0 %v2103_v32, %s3042_s22 }
 0x27b   : > { %1884 = vrot.lane.b32.xlu1 %v2151_v4, %s3044_s16  ;;  %v2212_v4 = vld [vmem:[%s4355_s10 + $0x30] sm:$0xff] }
 0x27c   : > { %2690 = vmatpush.msra.mxu3 %v2212_v4  ;;  %2252 = vmatpush.msrb.mxu1 %v2212_v4  ;;  %v911_v4 = vsub.f32 %v3502_v37, %v3583_v40 }
 0x27e   : > { %2691 = vmatpush.msra.mxu3 %v2211_v41  ;;  %2253 = vmatpush.msrb.mxu1 %v2211_v41  ;;  %v1055_v41 = vadd.f32 %v3965_v55, %v911_v4 }
 0x27f   : > { %v2152_v21 = vld [vmem:[#allocation2 + $0x42] sm:$0xff] }
 0x280   : > { %v2056_v56 = vld [vmem:[#allocation2 + $0x40] sm:$0xff]  ;;  %2170 = vrot.lane.b32.xlu2 %v2152_v21, %s3050_s27  ;;  %2692 = vmatpush.msra.mxu3 %v2210_v48 }
 0x281   : > { %v2104_v59 = vld [vmem:[#allocation2 + $0x41] sm:$0xff]  ;;  %1810 = vst.msk [vmem:[#allocation3 + $0x20] sm:$0xff] %vm797_vm0, %v2056_v56  ;;  %2074 = vrot.lane.b32.xlu0 %v2056_v56, %s3051_s30  ;;  %v1042_v23 = vpop.permute.xlu1 %1041  ;;  %2254 = vmatpush.msrb.mxu1 %v2210_v48 }
 0x282   : > { %v3975_v53 = vadd.f32 %v1042_v23, %v916_v61  ;;  %v2207_v23 = vld [vmem:[%s4355_s10 + $0x8] sm:$0xff] }
 0x283   : > { %2122 = vrot.lane.b32.xlu1 %v2104_v59, %s3049_s7 }
 0x288   : > { %1932 = vrot.lane.b32.xlu2 %v2056_v56, %s3046_s19 }
 0x289   : > { %1980 = vrot.lane.b32.xlu0 %v2104_v59, %s3047_s21 }
 0x28a   : > { %v1762_v47 = vpop.f32.mrf.mxu2 }
 0x28b   : > { %2028 = vrot.lane.b32.xlu1 %v2152_v21, %s3045_s1  ;;  %v1763_v28 = vadd.f32 %v3859_v14, %v1762_v47 }
 0x28d   : > { %v3984_v0 = vmax.f32 %v1763_v28, 0.0  ;;  %v2206_v28 = vld [vmem:[%s4355_s10] sm:$0xff] }
 0x28f   : > { %v1786_v31 = vadd.f32 %v3984_v0, %v1257_v63  ;;  %2304 = vst.msk [vmem:[%s3875_s24 + $0x20] sm:$0xff] %vm797_vm0, %v3984_v0 }
 0x290   : > { %1838 = vrot.lane.b32.xlu2 %v2104_v59, %s3042_s22  ;;  %v3993_v1 = vpop.permute.xlu2 %1045  ;;  %v2208_v59 = vld [vmem:[%s4355_s10 + $0x10] sm:$0xff] }
 0x291   : > { %1886 = vrot.lane.b32.xlu0 %v2152_v21, %s3044_s16  ;;  %1794 = vst.msk [vmem:[#allocation2 + $0x51] sm:$0xff] %vm797_vm0, %v1786_v31  ;;  %v2209_v21 = vld [vmem:[%s4355_s10 + $0x18] sm:$0xff] }
 0x292   : > { %2693 = vmatpush.msra.mxu3 %v2209_v21  ;;  %2255 = vmatpush.msrb.mxu1 %v2209_v21 }
 0x294   : > { %2694 = vmatpush.msra.mxu3 %v2208_v59  ;;  %2256 = vmatpush.msrb.mxu1 %v2208_v59 }
 0x296   : > { %2695 = vmatpush.msra.mxu3 %v2207_v23  ;;  %2257 = vmatpush.msrb.mxu1 %v2207_v23 }
 0x298   : > { %v2057_v3 = vld [vmem:[#allocation2 + $0x50] sm:$0xff]  ;;  %2696 = vmatpush.msra.mxu3 %v2206_v28  ;;  %2258 = vmatpush.msrb.mxu1 %v2206_v28 }
 0x299   : > { %v2153_v6 = vld [vmem:[#allocation2 + $0x52] sm:$0xff]  ;;  %2076 = vrot.lane.b32.xlu2 %v2057_v3, %s3051_s30  ;;  %1811 = vst.msk [vmem:[#allocation3 + $0x28] sm:$0xff] %vm797_vm0, %v2057_v3 }
 0x29a   : > { %v2105_v7 = vld [vmem:[#allocation2 + $0x51] sm:$0xff]  ;;  %2172 = vrot.lane.b32.xlu1 %v2153_v6, %s3050_s27 }
 0x29b   : > { %2124 = vrot.lane.b32.xlu0 %v2105_v7, %s3049_s7 }
 0x29c   : > { %v1833_v16 = vpop.permute.xlu2 %1832 }
 0x29d   : > { %1855 = vst.msk [vmem:[#allocation3 + $0x8] sm:$0xff] %vm1334_vm3, %v1833_v16 }
 0x2a1   : > { %1982 = vrot.lane.b32.xlu2 %v2105_v7, %s3047_s21 }
 0x2a2   : > { %1934 = vrot.lane.b32.xlu1 %v2057_v3, %s3046_s19  ;;  %v1765_v49 = vpop.f32.mrf.mxu2 }
 0x2a3   : > { %2030 = vrot.lane.b32.xlu0 %v2153_v6, %s3045_s1  ;;  %v1766_v51 = vadd.f32 %v3859_v14, %v1765_v49 }
 0x2a4   : > { %v1927_v9 = vpop.permute.xlu2 %1926 }
 0x2a5   : > { %1950 = vst.msk [vmem:[#allocation3] sm:$0xff] %vm1432_vm5, %v1927_v9  ;;  %v4006_v12 = vmax.f32 %v1766_v51, 0.0  ;;  %v1260_v51 = vld [vmem:[%s3863_s29 + $0x38] sm:$0xff] }
 0x2a7   : > { %v1787_v17 = vadd.f32 %v4006_v12, %v1258_v45  ;;  %2305 = vst.msk [vmem:[%s3875_s24 + $0x28] sm:$0xff] %vm797_vm0, %v4006_v12 }
 0x2a9   : > { %1795 = vst.msk [vmem:[#allocation2 + $0x61] sm:$0xff] %vm797_vm0, %v1787_v17  ;;  %1888 = vrot.lane.b32.xlu2 %v2153_v6, %s3044_s16 }
 0x2aa   : > { %1840 = vrot.lane.b32.xlu1 %v2105_v7, %s3042_s22 }
 0x2ac   : > { %v1977_v36 = vpop.permute.xlu2 %1976 }
 0x2b0   : > { %v2154_v30 = vld [vmem:[#allocation2 + $0x62] sm:$0xff] }
 0x2b1   : > { %v2106_v29 = vld [vmem:[#allocation2 + $0x61] sm:$0xff]  ;;  %2174 = vrot.lane.b32.xlu0 %v2154_v30, %s3050_s27 }
 0x2b2   : > { %v2058_v26 = vld [vmem:[#allocation2 + $0x60] sm:$0xff]  ;;  %2126 = vrot.lane.b32.xlu2 %v2106_v29, %s3049_s7 }
 0x2b3   : > { %1812 = vst.msk [vmem:[#allocation3 + $0x30] sm:$0xff] %vm797_vm0, %v2058_v26  ;;  %2078 = vrot.lane.b32.xlu1 %v2058_v26, %s3051_s30  ;;  %v1881_v35 = vpop.permute.xlu0 %1880 }
 0x2b4   : > { %1903 = vst.msk [vmem:[#allocation3 + $0x8] sm:$0xff] %vm1383_vm4, %v1881_v35  ;;  %v1883_v56 = vpop.permute.xlu2 %1882 }
 0x2b9   : > { %1936 = vrot.lane.b32.xlu0 %v2058_v26, %s3046_s19  ;;  %v1768_v39 = vpop.f32.mrf.mxu2 }
 0x2ba   : > { %2032 = vrot.lane.b32.xlu2 %v2154_v30, %s3045_s1  ;;  %v1769_v32 = vadd.f32 %v3859_v14, %v1768_v39 }
 0x2bb   : > { %1984 = vrot.lane.b32.xlu1 %v2106_v29, %s3047_s21 }
 0x2bc   : > { %v4039_v20 = vmax.f32 %v1769_v32, 0.0 }
 0x2be   : > { %v1788_v44 = vadd.f32 %v4039_v20, %v1259_v27  ;;  %2306 = vst.msk [vmem:[%s3875_s24 + $0x30] sm:$0xff] %vm797_vm0, %v4039_v20 }
 0x2c0   : > { %1796 = vst.msk [vmem:[#allocation2 + $0x71] sm:$0xff] %vm797_vm0, %v1788_v44  ;;  %v2633_v44 = vadd.f32 -1.0, %v1055_v41 }
 0x2c1   : > { %1842 = vrot.lane.b32.xlu0 %v2106_v29, %s3042_s22 }
 0x2c2   : > { %v2025_v47 = vpop.permute.xlu0 %2024  ;;  %v1071_v55 = vmul.f32 0.5, %v2633_v44 }
 0x2c3   : > { %1890 = vrot.lane.b32.xlu1 %v2154_v30, %s3044_s16  ;;  %v1929_v61 = vpop.permute.xlu1 %1928 }
 0x2c4   : > { %1951 = vst.msk [vmem:[#allocation3 + $0x8] sm:$0xff] %vm1432_vm5, %v1929_v61  ;;  %v2121_v6 = vpop.permute.xlu2 %2120 }
 0x2c5   : > { %1999 = vst.msk [vmem:[#allocation3 + $0x8] sm:$0xff] %vm1481_vm6, %v1977_v36 }
 0x2c6   : > { %2047 = vst.msk [vmem:[#allocation3 + $0x8] sm:$0xff] %vm1530_vm7, %v2025_v47 }
 0x2c7   : > { %v2155_v63 = vld [vmem:[#allocation2 + $0x72] sm:$0xff] }
 0x2c8   : > { %v2059_v31 = vld [vmem:[#allocation2 + $0x70] sm:$0xff]  ;;  %2176 = vrot.lane.b32.xlu2 %v2155_v63, %s3050_s27  ;;  %v1771_v7 = vpop.f32.mrf.mxu2 }
 0x2c9   : > { %v2107_v3 = vld [vmem:[#allocation2 + $0x71] sm:$0xff]  ;;  %1813 = vst.msk [vmem:[#allocation3 + $0x38] sm:$0xff] %vm797_vm0, %v2059_v31  ;;  %2080 = vrot.lane.b32.xlu0 %v2059_v31, %s3051_s30  ;;  %v1772_v49 = vadd.f32 %v3859_v14, %v1771_v7 }
 0x2cb   : > { %2128 = vrot.lane.b32.xlu1 %v2107_v3, %s3049_s7  ;;  %v1835_v16 = vpop.permute.xlu1 %1834  ;;  %v4074_v9 = vmax.f32 %v1772_v49, 0.0 }
 0x2cc   : > { %1856 = vst.msk [vmem:[#allocation3 + $0x10] sm:$0xff] %vm1334_vm3, %v1835_v16  ;;  %v2027_v17 = vpop.permute.xlu2 %2026 }
 0x2cd   : > { %1904 = vst.msk [vmem:[#allocation3 + $0x10] sm:$0xff] %vm1383_vm4, %v1883_v56  ;;  %v1789_v45 = vadd.f32 %v4074_v9, %v1260_v51  ;;  %v917_v56 = vsub.f32 %v3609_v54, %v3618_v58  ;;  %v2635_v58 = vadd.f32 -1.0, %v3932_v57 }
 0x2ce   : > { %2307 = vst.msk [vmem:[%s3875_s24 + $0x38] sm:$0xff] %vm797_vm0, %v4074_v9 }
 0x2cf   : > { %1797 = vst.msk [vmem:[#allocation2 + $0x81] sm:$0xff] %vm797_vm0, %v1789_v45  ;;  %v1061_v61 = vadd.f32 %v3980_v11, %v917_v56  ;;  %v915_v11 = vsub.f32 %v3577_v38, %v3647_v13  ;;  %v1073_v28 = vmul.f32 0.5, %v2635_v58  ;;  %v2638_v13 = vadd.f32 -1.0, %v3975_v53 }
 0x2d0   : > { %1938 = vrot.lane.b32.xlu2 %v2059_v31, %s3046_s19 }
 0x2d1   : > { %1986 = vrot.lane.b32.xlu0 %v2107_v3, %s3047_s21 }
 0x2d3   : > { %2034 = vrot.lane.b32.xlu1 %v2155_v63, %s3045_s1 }
 0x2d6   : > { %v2060_v14 = vld [vmem:[#allocation2 + $0x80] sm:$0xff] }
 0x2d7   : > { %v2013_v33 = vld [vmem:[#allocation2 + $0x82] sm:$0xff] }
 0x2d8   : > { %2082 = vrot.lane.b32.xlu2 %v2060_v14, %s3051_s30  ;;  %v2108_v34 = vld [vmem:[#allocation2 + $0x81] sm:$0xff] }
 0x2d9   : > { %1844 = vrot.lane.b32.xlu0 %v2107_v3, %s3042_s22 }
 0x2da   : > { %v2171_v30 = vpop.permute.xlu2 %2170 }
 0x2db   : > { %1892 = vrot.lane.b32.xlu1 %v2155_v63, %s3044_s16  ;;  %v2169_v29 = vpop.permute.xlu0 %2168  ;;  %v918_v63 = vsub.f32 %v3629_v2, %v3604_v52 }
 0x2dd   : > { %v2073_v26 = vpop.permute.xlu1 %2072 }
 0x2de   : > { %2095 = vst.msk [vmem:[#allocation3 + $0x8] sm:$0xff] %vm1580_vm8, %v2073_v26 }
 0x2df   : > { %2143 = vst.msk [vmem:[#allocation3 + $0x8] sm:$0xff] %vm1629_vm9, %v2121_v6  ;;  %v1076_v6 = vmul.f32 0.5, %v2638_v13 }
 0x2e0   : > { %2191 = vst.msk [vmem:[#allocation3 + $0x8] sm:$0xff] %vm1678_vm10, %v2169_v29  ;;  %2036 = vrot.lane.b32.xlu2 %v2013_v33, %s3045_s1 }
 0x2e1   : > { %2130 = vrot.lane.b32.xlu0 %v2108_v34, %s3049_s7 }
 0x2e2   : > { %v1933_v35 = vpop.permute.xlu2 %1932 }
 0x2e3   : > { %2178 = vrot.lane.b32.xlu1 %v2013_v33, %s3050_s27  ;;  %v1931_v36 = vpop.permute.xlu0 %1930 }
 0x2e4   : > { %1952 = vst.msk [vmem:[#allocation3 + $0x10] sm:$0xff] %vm1432_vm5, %v1931_v36 }
 0x2e5   : > { %v1979_v39 = vpop.permute.xlu1 %1978 }
 0x2e6   : > { %2000 = vst.msk [vmem:[#allocation3 + $0x10] sm:$0xff] %vm1481_vm6, %v1979_v39 }
 0x2e7   : > { %2048 = vst.msk [vmem:[#allocation3 + $0x10] sm:$0xff] %vm1530_vm7, %v2027_v17  ;;  %v2199_v32 = vld [vmem:[#allocation3 + $0x8] sm:$0xff] }
 0x2e8   : > { %2658 = vmatmul.msk.f32.vlgmr.msra.gmra.mxu3 %vm1708_vm11, %v2199_v32  ;;  %2070 = vrot.lane.b32.xlu2 %v3918_v19, %s3051_s30  ;;  %v2636_v19 = vadd.f32 -1.0, %v3906_v18  ;;  %s2678_s30 = sshll.u32 %s3164_s28, 6  ;;  %s2984_s28 = scalar_lea.hbm %s4359_s0, 128 }
 0x2e9   : > { %1940 = vrot.lane.b32.xlu0 %v2060_v14, %s3046_s19  ;;  %s4356_s19 = sld [smem:[#allocation33_spill]]  ;;  %s2347_s9 = scalar_lea.hbm %s4359_s0, %s2678_s30 }
 0x2ea   : > { %v1839_v27 = vpop.permute.xlu2 %1838  ;;  %v1074_v59 = vmul.f32 0.5, %v2636_v19  ;;  %s2350_s20 = sshll.u32 %s2347_s9, 4  ;;  %s2351_s20 = int_to_ptr.hbm [resolvable:$true] %s2350_s20 }
 0x2eb   : > { %1988 = vrot.lane.b32.xlu1 %v2108_v34, %s3047_s21  ;;  %1858 = vst.msk [vmem:[#allocation3 + $0x20] sm:$0xff] %vm1334_vm3, %v1839_v27  ;;  %v1837_v37 = vpop.permute.xlu0 %1836  ;;  %s2978_s13 = sshra.s32 %s2351_s20, 4  ;;  %s2979_s13 = int_to_ptr.hbm [resolvable:$true] %s2978_s13 }
 0x2ec   : > { %1857 = vst.msk [vmem:[#allocation3 + $0x18] sm:$0xff] %vm1334_vm3, %v1837_v37  ;;  %s2980_s16 = scalar_lea.hbm %s2979_s13, 64  ;;  %p2985_p4 = scmp.lt.s32.totalorder %s2979_s13, %s4359_s0 }
 0x2ed   : > { %v1885_v40 = vpop.permute.xlu1 %1884  ;;  %p2981_p6 = scmp.ne.s32.totalorder %s2979_s13, %s2980_s16  ;;  %p2986_p5 = scmp.lt.s32.totalorder %s2984_s28, %s2980_s16 }
 0x2ee   : > { %1905 = vst.msk [vmem:[#allocation3 + $0x18] sm:$0xff] %vm1383_vm4, %v1885_v40 }
 0x2ef   : > { %1953 = vst.msk [vmem:[#allocation3 + $0x18] sm:$0xff] %vm1432_vm5, %v1933_v35  ;;  %p2982_p2 = pnand %p2981_p6, %p3189_p11  ;;  %p2987_p7 = por %p2986_p5, %p2985_p4 }
 0x2f0   : > { %1087 = vrot.lane.b32.xlu2 %v1071_v55, %s3048_s4 }
 0x2f1   : > { %1974 = vrot.lane.b32.xlu0 %v3890_v24, %s3047_s21  ;;  %v2639_v24 = vadd.f32 -1.0, %v1061_v61  ;;  %p2983_p3 = pneg %p2982_p2 }
 0x2f3   : > { %2022 = vrot.lane.b32.xlu1 %v3888_v50, %s3045_s1  ;;  %v2075_v48 = vpop.permute.xlu0 %2074  ;;  %v2634_v50 = vadd.f32 -1.0, %v3884_v8  ;;  %v2077_v18 = vpop.permute.xlu2 %2076  ;;  %v1059_v8 = vadd.f32 %v4015_v15, %v915_v11  ;;  %v1062_v15 = vadd.f32 %v3993_v1, %v918_v63  ;;  %p2988_p0 = pnand %p2987_p7, %p2983_p3 }
 0x2f4   : > { %2096 = vst.msk [vmem:[#allocation3 + $0x10] sm:$0xff] %vm1580_vm8, %v2075_v48 }
 0x2f5   : > { %v2123_v21 = vpop.permute.xlu1 %2122  ;;  %v2637_v57 = vadd.f32 -1.0, %v1059_v8  ;;  %v2640_v7 = vadd.f32 -1.0, %v1062_v15 }
 0x2f6   : > { %2144 = vst.msk [vmem:[#allocation3 + $0x10] sm:$0xff] %vm1629_vm9, %v2123_v21 }
 0x2f7   : > { %2192 = vst.msk [vmem:[#allocation3 + $0x10] sm:$0xff] %vm1678_vm10, %v2171_v30  ;;  %v1075_v3 = vmul.f32 0.5, %v2637_v57  ;;  %v1078_v53 = vmul.f32 0.5, %v2640_v7 }
 0x2f8   : > { %1093 = vrot.lane.b32.xlu2 %v1074_v59, %s3048_s4 }
 0x2f9   : > { %2118 = vrot.lane.b32.xlu0 %v3920_v25, %s3049_s7  ;;  %v1077_v25 = vmul.f32 0.5, %v2639_v24  ;;  %s4357_s7 = sld [smem:[#allocation37_spill]] }
 0x2fb   : > { %2166 = vrot.lane.b32.xlu1 %v3916_v43, %s3050_s27  ;;  %v1981_v54 = vpop.permute.xlu0 %1980  ;;  %v1072_v43 = vmul.f32 0.5, %v2634_v50  ;;  %v1983_v31 = vpop.permute.xlu2 %1982 }
 0x2fc   : > { %2001 = vst.msk [vmem:[#allocation3 + $0x18] sm:$0xff] %vm1481_vm6, %v1981_v54 }
 0x2fd   : > { %v2029_v23 = vpop.permute.xlu1 %2028 }
 0x2fe   : > { %2049 = vst.msk [vmem:[#allocation3 + $0x18] sm:$0xff] %vm1530_vm7, %v2029_v23  ;;  %v2200_v47 = vld [vmem:[#allocation3 + $0x10] sm:$0xff] }
 0x2ff   : > { %2097 = vst.msk [vmem:[#allocation3 + $0x18] sm:$0xff] %vm1580_vm8, %v2077_v18  ;;  %2659 = vmatmul.msk.f32.gmra.mxu3 %vm1708_vm11, %v2200_v47  ;;  %s4200_s27 = scalar_lea.vmem %s4357_s7, %s3367_s17 }
 0x300   : > { %1099 = vrot.lane.b32.xlu2 %v1077_v25, %s3048_s4 }
 0x301   : > { %1089 = vrot.lane.b32.xlu0 %v1072_v43, %s3048_s4 }
 0x303   : > { %1091 = vrot.lane.b32.xlu1 %v1073_v28, %s3048_s4  ;;  %v1887_v38 = vpop.permute.xlu0 %1886  ;;  %v1889_v51 = vpop.permute.xlu2 %1888 }
 0x304   : > { %1906 = vst.msk [vmem:[#allocation3 + $0x20] sm:$0xff] %vm1383_vm4, %v1887_v38 }
 0x309   : > { %1095 = vrot.lane.b32.xlu0 %v1075_v3, %s3048_s4 }
 0x30b   : > { %1097 = vrot.lane.b32.xlu1 %v1076_v6, %s3048_s4 }
 0x30c   : > { %v2173_v16 = vpop.permute.xlu1 %2172  ;;  %v2127_v45 = vpop.permute.xlu2 %2126 }
 0x30d   : > { %v2125_v49 = vpop.permute.xlu0 %2124 }
 0x30e   : > { %2145 = vst.msk [vmem:[#allocation3 + $0x18] sm:$0xff] %vm1629_vm9, %v2125_v49 }
 0x30f   : > { %2193 = vst.msk [vmem:[#allocation3 + $0x18] sm:$0xff] %vm1678_vm10, %v2173_v16 }
 0x311   : > { %1101 = vrot.lane.b32.xlu0 %v1078_v53, %s3048_s4 }
 0x314   : > { %v1935_v52 = vpop.permute.xlu1 %1934  ;;  %v2033_v14 = vpop.permute.xlu2 %2032 }
 0x315   : > { %1954 = vst.msk [vmem:[#allocation3 + $0x20] sm:$0xff] %vm1432_vm5, %v1935_v52  ;;  %v2031_v2 = vpop.permute.xlu0 %2030 }
 0x316   : > { %2002 = vst.msk [vmem:[#allocation3 + $0x20] sm:$0xff] %vm1481_vm6, %v1983_v31  ;;  %v2201_v1 = vld [vmem:[#allocation3 + $0x18] sm:$0xff] }
 0x317   : > { %2050 = vst.msk [vmem:[#allocation3 + $0x20] sm:$0xff] %vm1530_vm7, %v2031_v2  ;;  %2660 = vmatmul.msk.f32.gmra.mxu3 %vm1708_vm11, %v2201_v1 }
 0x31c   : > { %v1841_v17 = vpop.permute.xlu1 %1840 }
 0x31d   : > { %1859 = vst.msk [vmem:[#allocation3 + $0x28] sm:$0xff] %vm1334_vm3, %v1841_v17 }
 0x31e   : > { %1907 = vst.msk [vmem:[#allocation3 + $0x28] sm:$0xff] %vm1383_vm4, %v1889_v51 }
 0x322   : > { %v2177_v26 = vpop.permute.xlu2 %2176 }
 0x323   : > { %v2175_v30 = vpop.permute.xlu0 %2174 }
 0x325   : > { %v2079_v29 = vpop.permute.xlu1 %2078 }
 0x326   : > { %2098 = vst.msk [vmem:[#allocation3 + $0x20] sm:$0xff] %vm1580_vm8, %v2079_v29 }
 0x327   : > { %2146 = vst.msk [vmem:[#allocation3 + $0x20] sm:$0xff] %vm1629_vm9, %v2127_v45 }
 0x328   : > { %2194 = vst.msk [vmem:[#allocation3 + $0x20] sm:$0xff] %vm1678_vm10, %v2175_v30 }
 0x32a   : > { %v1939_v4 = vpop.permute.xlu2 %1938 }
 0x32b   : > { %v1937_v33 = vpop.permute.xlu0 %1936 }
 0x32c   : > { %1955 = vst.msk [vmem:[#allocation3 + $0x28] sm:$0xff] %vm1432_vm5, %v1937_v33 }
 0x32d   : > { %v1985_v34 = vpop.permute.xlu1 %1984 }
 0x32e   : > { %2003 = vst.msk [vmem:[#allocation3 + $0x28] sm:$0xff] %vm1481_vm6, %v1985_v34 }
 0x32f   : > { %2051 = vst.msk [vmem:[#allocation3 + $0x28] sm:$0xff] %vm1530_vm7, %v2033_v14  ;;  %v2202_v35 = vld [vmem:[#allocation3 + $0x20] sm:$0xff] }
 0x330   : > { %2661 = vmatmul.msk.f32.gmra.mxu3 %vm1708_vm11, %v2202_v35 }
 0x332   : > { %v2083_v37 = vpop.permute.xlu2 %2082 }
 0x333   : > { %v1843_v36 = vpop.permute.xlu0 %1842 }
 0x334   : > { %1860 = vst.msk [vmem:[#allocation3 + $0x30] sm:$0xff] %vm1334_vm3, %v1843_v36 }
 0x335   : > { %v1891_v39 = vpop.permute.xlu1 %1890 }
 0x336   : > { %1908 = vst.msk [vmem:[#allocation3 + $0x30] sm:$0xff] %vm1383_vm4, %v1891_v39 }
 0x337   : > { %1956 = vst.msk [vmem:[#allocation3 + $0x30] sm:$0xff] %vm1432_vm5, %v1939_v4 }
 0x33a   : > { %v2037_v56 = vpop.permute.xlu2 %2036 }
 0x33b   : > { %v2081_v32 = vpop.permute.xlu0 %2080 }
 0x33c   : > { %2099 = vst.msk [vmem:[#allocation3 + $0x28] sm:$0xff] %vm1580_vm8, %v2081_v32 }
 0x33d   : > { %v2129_v41 = vpop.permute.xlu1 %2128 }
 0x33e   : > { %2147 = vst.msk [vmem:[#allocation3 + $0x28] sm:$0xff] %vm1629_vm9, %v2129_v41 }
 0x33f   : > { %2195 = vst.msk [vmem:[#allocation3 + $0x28] sm:$0xff] %vm1678_vm10, %v2177_v26 }
 0x342   : > { %v2071_v24 = vpop.permute.xlu2 %2070 }
 0x343   : > { %v1987_v27 = vpop.permute.xlu0 %1986 }
 0x344   : > { %2004 = vst.msk [vmem:[#allocation3 + $0x30] sm:$0xff] %vm1481_vm6, %v1987_v27 }
 0x345   : > { %v2035_v44 = vpop.permute.xlu1 %2034 }
 0x346   : > { %2052 = vst.msk [vmem:[#allocation3 + $0x30] sm:$0xff] %vm1530_vm7, %v2035_v44  ;;  %v2203_v40 = vld [vmem:[#allocation3 + $0x28] sm:$0xff] }
 0x347   : > { %2100 = vst.msk [vmem:[#allocation3 + $0x30] sm:$0xff] %vm1580_vm8, %v2083_v37  ;;  %2662 = vmatmul.msk.f32.gmra.mxu3 %vm1708_vm11, %v2203_v40 }
 0x34a   : > { %v1088_v23 = vpop.permute.xlu2 %1087 }
 0x34b   : > { %v1845_v55 = vpop.permute.xlu0 %1844  ;;  %v1111_v28 = vsel %vm797_vm0, %v1088_v23, 0.0 }
 0x34c   : > { %1861 = vst.msk [vmem:[#allocation3 + $0x38] sm:$0xff] %vm1334_vm3, %v1845_v55 }
 0x34d   : > { %v1893_v19 = vpop.permute.xlu1 %1892 }
 0x34e   : > { %1909 = vst.msk [vmem:[#allocation3 + $0x38] sm:$0xff] %vm1383_vm4, %v1893_v19 }
 0x352   : > { %v1094_v63 = vpop.permute.xlu2 %1093 }
 0x353   : > { %v2131_v48 = vpop.permute.xlu0 %2130  ;;  %v1116_v6 = vsel %vm797_vm0, %v1094_v63, 0.0 }
 0x354   : > { %2148 = vst.msk [vmem:[#allocation3 + $0x30] sm:$0xff] %vm1629_vm9, %v2131_v48 }
 0x355   : > { %v2179_v21 = vpop.permute.xlu1 %2178 }
 0x356   : > { %2196 = vst.msk [vmem:[#allocation3 + $0x30] sm:$0xff] %vm1678_vm10, %v2179_v21 }
 0x35a   : > { %v1100_v52 = vpop.permute.xlu2 %1099 }
 0x35b   : > { %v1941_v59 = vpop.permute.xlu0 %1940  ;;  %v1122_v45 = vsel %vm797_vm0, %v1100_v52, 0.0 }
 0x35c   : > { %1957 = vst.msk [vmem:[#allocation3 + $0x38] sm:$0xff] %vm1432_vm5, %v1941_v59 }
 0x35d   : > { %v1989_v61 = vpop.permute.xlu1 %1988  ;;  %v2204_v50 = vld [vmem:[#allocation3 + $0x30] sm:$0xff] }
 0x35e   : > { %2005 = vst.msk [vmem:[#allocation3 + $0x38] sm:$0xff] %vm1481_vm6, %v1989_v61  ;;  %2663 = vmatmul.msk.f32.gmra.mxu3 %vm1708_vm11, %v2204_v50 }
 0x35f   : > { %2053 = vst.msk [vmem:[#allocation3 + $0x38] sm:$0xff] %vm1530_vm7, %v2037_v56 }
 0x360   : > { %2101 = vst.msk [vmem:[#allocation3 + $0x38] sm:$0xff] %vm1580_vm8, %v3904_v62  ;;  %v4190_v62 = vld [vmem:[%s4356_s19] ss:$0 sm:$0xff] }
 0x361   : > { %2149 = vst.msk [vmem:[#allocation3 + $0x38] sm:$0xff] %vm1629_vm9, %v3866_v5 }
 0x362   : > { %2197 = vst.msk [vmem:[#allocation3 + $0x38] sm:$0xff] %vm1678_vm10, %v3951_v42 }
 0x363   : > { %v1975_v18 = vpop.permute.xlu0 %1974 }
 0x364   : > { %1998 = vst.msk [vmem:[#allocation3] sm:$0xff] %vm1481_vm6, %v1975_v18 }
 0x365   : > { %v2023_v54 = vpop.permute.xlu1 %2022 }
 0x366   : > { %2046 = vst.msk [vmem:[#allocation3] sm:$0xff] %vm1530_vm7, %v2023_v54 }
 0x367   : > { %2094 = vst.msk [vmem:[#allocation3] sm:$0xff] %vm1580_vm8, %v2071_v24 }
 0x369   : > { %v2205_v58 = vld [vmem:[#allocation3 + $0x38] sm:$0xff] }
 0x36a   : > { %2664 = vmatmul.msk.f32.gmra.mxu3 %vm1708_vm11, %v2205_v58 }
 0x36b   : > { %v2263_v5 = vpop.f32.mrf.mxu3  ;;  %v2119_v11 = vpop.permute.xlu0 %2118 }
 0x36c   : > { %v2264_v42 = vadd.f32 %v4190_v62, %v2263_v5  ;;  %2142 = vst.msk [vmem:[#allocation3] sm:$0xff] %vm1629_vm9, %v2119_v11 }
 0x36d   : > { %v2167_v47 = vpop.permute.xlu1 %2166 }
 0x36e   : > { %v2285_v43 = vmax.f32 %v2264_v42, 0.0  ;;  %2190 = vst.msk [vmem:[#allocation3] sm:$0xff] %vm1678_vm10, %v2167_v47 }
 0x370   : > { %v2293_v8 = vadd.f32 %v2285_v43, %v3901_v10 }
 0x372   : > { %2309 = vst.msk [vmem:[%s4200_s27 + $0x8] sm:$0xff] %vm797_vm0, %v2293_v8 }
 0x373   : > { %v1090_v25 = vpop.permute.xlu0 %1089 }
 0x374   : > { %v1112_v57 = vsel %vm797_vm0, %v1090_v25, 0.0 }
 0x375   : > { %v1092_v38 = vpop.permute.xlu1 %1091  ;;  %v2198_v13 = vld [vmem:[#allocation3] sm:$0xff]  ;;  %v1113_v31 = vadd.f32 %v1112_v57, %v1111_v28 }
 0x376   : > { %2657 = vmatmul.msk.f32.vlgmr.msrb.gmra.mxu1 %vm1708_vm11, %v2198_v13  ;;  %v1114_v3 = vsel %vm797_vm0, %v1092_v38, 0.0 }
 0x377   : > { %v1115_v15 = vadd.f32 %v1114_v3, %v1113_v31 }
 0x379   : > { %v1117_v10 = vadd.f32 %v1116_v6, %v1115_v15 }
 0x37b   : > { %v1096_v7 = vpop.permute.xlu0 %1095 }
 0x37c   : > { %v1118_v16 = vsel %vm797_vm0, %v1096_v7, 0.0 }
 0x37d   : > { %v1098_v49 = vpop.permute.xlu1 %1097  ;;  %v1119_v53 = vadd.f32 %v1118_v16, %v1117_v10 }
 0x37e   : > { %v1120_v51 = vsel %vm797_vm0, %v1098_v49, 0.0 }
 0x37f   : > { %v1121_v2 = vadd.f32 %v1120_v51, %v1119_v53 }
 0x381   : > { %v1123_v30 = vadd.f32 %v1122_v45, %v1121_v2 }
 0x382   : > { %v2266_v1 = vpop.f32.mrf.mxu3 }
 0x383   : > { %v2267_v17 = vadd.f32 %v4190_v62, %v2266_v1  ;;  %v1102_v14 = vpop.permute.xlu0 %1101 }
 0x384   : > { %v1124_v26 = vsel %vm797_vm0, %v1102_v14, 0.0 }
 0x385   : > { %v2286_v29 = vmax.f32 %v2267_v17, 0.0  ;;  %v1125_v33 = vadd.f32 %v1124_v26, %v1123_v30 }
 0x387   : > { %v2294_v34 = vadd.f32 %v2286_v29, %v3940_v22  ;;  %1126 = vadd.xlane.f32.xlu1 %v1125_v33 }
 0x389   : > { %2310 = vst.msk [vmem:[%s4200_s27 + $0x10] sm:$0xff] %vm797_vm0, %v2294_v34 }
 0x39a   : > { %v2269_v35 = vpop.f32.mrf.mxu3 }
 0x39b   : > { %v2270_v36 = vadd.f32 %v4190_v62, %v2269_v35 }
 0x39d   : > { %v2287_v39 = vmax.f32 %v2270_v36, 0.0 }
 0x39f   : > { %v2295_v4 = vadd.f32 %v2287_v39, %v3958_v46 }
 0x3a1   : > { %2311 = vst.msk [vmem:[%s4200_s27 + $0x18] sm:$0xff] %vm797_vm0, %v2295_v4 }
 0x3b3   : > { %v2272_v32 = vpop.f32.mrf.mxu3 }
 0x3b4   : > { %v2273_v41 = vadd.f32 %v4190_v62, %v2272_v32 }
 0x3b6   : > { %v2288_v27 = vmax.f32 %v2273_v41, 0.0 }
 0x3b8   : > { %v2296_v44 = vadd.f32 %v2288_v27, %v3984_v0 }
 0x3ba   : > { %2312 = vst.msk [vmem:[%s4200_s27 + $0x20] sm:$0xff] %vm797_vm0, %v2296_v44 }
 0x3bb   : > { %2991 = shalt.err (!%p2988_p0)
}
 0x3bc   : > { %s3052_s11 = smov 128   ;;  %s4360_s7 = sld [smem:[#allocation34_spill]] }
 0x3bd   : > { %2709 = dma.vmem_to_hbm [thread:$0]  (%p3189_p11), %s2349_s23, 1024, %s2351_s20, %s2325_s18, %s3052_s11, %s3052_s11, %s3042_s22  }
 0x3c2   : > { %s773_s17 = scalar_lea.vmem %s4360_s7, %s3364_s6 }
 0x3ca   : > { %v2275_v22 = vpop.f32.mrf.mxu3 }
 0x3cb   : > { %v2276_v46 = vadd.f32 %v4190_v62, %v2275_v22 }
 0x3cd   : > { %v2289_v0 = vmax.f32 %v2276_v46, 0.0 }
 0x3cf   : > { %v2297_v37 = vadd.f32 %v2289_v0, %v4006_v12 }
 0x3d1   : > { %2313 = vst.msk [vmem:[%s4200_s27 + $0x28] sm:$0xff] %vm797_vm0, %v2297_v37 }
 0x3e1   : > { %v2278_v40 = vpop.f32.mrf.mxu3 }
 0x3e2   : > { %v2279_v55 = vadd.f32 %v4190_v62, %v2278_v40 }
 0x3e4   : > { %v2290_v19 = vmax.f32 %v2279_v55, 0.0 }
 0x3e6   : > { %v2298_v48 = vadd.f32 %v2290_v19, %v4039_v20 }
 0x3e8   : > { %2314 = vst.msk [vmem:[%s4200_s27 + $0x30] sm:$0xff] %vm797_vm0, %v2298_v48 }
 0x3ed   : > { %v2281_v21 = vpop.f32.mrf.mxu3 }
 0x3ee   : > { %v2282_v56 = vadd.f32 %v4190_v62, %v2281_v21 }
 0x3f0   : > { %v2291_v59 = vmax.f32 %v2282_v56, 0.0 }
 0x3f2   : > { %v2299_v61 = vadd.f32 %v2291_v59, %v4074_v9 }
 0x3f3   : > { %v2260_v50 = vpop.f32.mrf.mxu1 }
 0x3f4   : > { %2315 = vst.msk [vmem:[%s4200_s27 + $0x38] sm:$0xff] %vm797_vm0, %v2299_v61  ;;  %v2261_v12 = vadd.f32 %v4190_v62, %v2260_v50 }
 0x3f6   : > { %v2284_v24 = vmax.f32 %v2261_v12, 0.0 }
 0x3f8   : > { %v2292_v18 = vadd.f32 %v2284_v24, %v3868_v60 }
 0x3fa   : > { %2308 = vst.msk [vmem:[%s4200_s27] sm:$0xff] %vm797_vm0, %v2292_v18  ;;  %v1127_v20 = vpop.xlane.xlu1 %1126 }
 0x3fb   : > { %v1128_v54 = vrot.slane %v1127_v20, 4 }
 0x3fd   : > { %v1129_v58 = vadd.f32 %v1128_v54, %v1127_v20 }
 0x3ff   : > { %v1130_v5 = vrot.slane %v1129_v58, 2 }
 0x401   : > { %v1131_v23 = vadd.f32 %v1130_v5, %v1129_v58 }
 0x403   : > { %v1132_v42 = vrot.slane %v1131_v23, 1 }
 0x405   : > { %v1133_v11 = vadd.f32 %v1132_v42, %v1131_v23 }
 0x407   : > { %2697 = vpush %v1133_v11 }
 0x438   : > { %s2698_s30 = spop %2697 }
 0x439   : > { %v1135_v9 = vstv %s2698_s30 }
 0x43a   : > { %1136 = vst [vmem:[%s773_s17] sm:$0x1] %v1135_v9 }
 0x43b PF: > { %s4361_s29 = sld [smem:[#allocation18_spill]]  ;;  %p2728_p11 = pnand %p2596_p9, %p3193_p12 }
 0x43d   : > { %p2729_p8 = pneg %p2728_p11 }
 0x441   : > { %s2382_s27 = sand.u32 1, %s4361_s29  }
 0x442   : > { %s2383_s23 = scalar_lea.sflag [#allocation6], %s2382_s27 }
 0x443   : > { %3021 = dma.done.wait (%p2729_p8), %s2383_s23, 1024  }
 0x444   : > { %3023 = vsyncadd (%p2729_p8), %s2383_s23, 4294966272  ;;  %s4364_s27 = sld [smem:[#allocation20_spill]]  ;;  %s4366_s24 = smov %s3030_s25 }
 0x445   : > { %s4365_s20 = sld [smem:[#allocation21_spill]]  ;;  %s4367_s25 = smov %s3034_s26 }
 0x44a   : > { %p37_p10 = scmp.ge.s32.totalorder %s4364_s27, 4  }
 0x44b   : > { %s4368_s26 = smov %s4365_s20 }
 0x44c   :  { %39 = sbr.rel (!%p37_p10) target bundleno = 24 (0x18), region = 210 }
 0x451   :  { %2397 = vsyncpa [#allocation5], 1 }
 0x452   :  { %2399 = vsyncpa [#allocation5 + $0x1], 1 }
 0x453   :  { %2400 = vsyncpa [#allocation8], 1 }
 0x454   :  { %2402 = vsyncpa [#allocation8 + $0x1], 1 }
 0x455   :  { %2403 = vsyncpa [#allocation11], 1 }
 0x456   :  { %2405 = vsyncpa [#allocation11 + $0x1], 1 }
 0x457   :  { %2406 = vsyncpa [#allocation6], 1 }
 0x458   :  { %2408 = vsyncpa [#allocation6 + $0x1], 1 }

</bundles_post_ra>
